<compile_context>
chip_gen: v7x
topology: tpu7x:2x2x1
jax: 0.10.0
libtpu: 0.0.40
codegen_flags: <defaults>
</compile_context>

<pallas_src>
import jax
import jax.numpy as jnp
from jax.experimental import pallas as pl
from jax.experimental.pallas import tpu as pltpu


def conv3x3_relu_kernel(x_ref, w_ref, b_ref, o_ref):
    # x_ref: (NB, H+2, W_pad+2, Cin)   full padded image(s), resident across H tiles
    # w_ref: (3, 3*Cin, Cout_p)        taps grouped per kh, (kw, cin) flattened minor
    # b_ref: (1, Cout_p)               f32 bias
    # o_ref: (NB, TH*W_pad, Cout_p)    lane-dense output tile
    NB, Hp2, Wp2, Cin = x_ref.shape
    Wp = Wp2 - 2
    _, M, Cout_p = o_ref.shape
    TH = M // Wp

    t = pl.program_id(1)
    row0 = t * TH  # first output row of this H tile

    acc = jnp.zeros((NB * TH * Wp, Cout_p), jnp.float32)
    for kh in range(3):
        # (NB, TH, Wp+2, Cin) window for this kernel row (dynamic slice of the
        # resident image along the outer H axis — alignment-free).
        xkh = x_ref[:, pl.ds(row0 + kh, TH), :, :]
        # Per-kh im2col: concat the 3 kw shifts on the lane axis -> (NB, TH, Wp, 3*Cin)
        patch = jnp.concatenate(
            [xkh[:, :, kw:kw + Wp, :] for kw in range(3)], axis=-1
        ).reshape(NB * TH * Wp, 3 * Cin)
        acc = acc + jnp.dot(patch, w_ref[kh], preferred_element_type=jnp.float32)

    acc = acc + b_ref[...].astype(jnp.float32)
    o_ref[...] = jnp.maximum(acc, 0.0).reshape(NB, TH * Wp, Cout_p).astype(o_ref.dtype)


def _round_up(a, m):
    return (a + m - 1) // m * m


def _vmem_budget():
    """(tile budget, vmem_limit_bytes) derived from the actual chip's VMEM capacity
    (64 MiB on v7x, 128 MiB on v5e/v6e); conservative fallback if the query fails."""
    cap = None
    try:
        cap = getattr(pltpu.get_tpu_info(), "vmem_capacity_bytes", None)
    except Exception:
        cap = None
    if not cap:
        cap = 64 << 20  # v7x physical VMEM — the smallest of the current generations
    return int(cap * 0.70), int(cap * 0.85)


def _pick_tile_h(H, W_pad, Cin, Cout_p, NB, cdt_size, out_size, budget_bytes):
    """Largest divisor TH of H whose per-step working set fits the budget.
    Counts: resident (double-buffered) padded input image, single-buffered weights,
    double-buffered output tile, per-kh im2col patch (+temps) and the f32 accumulator.
    Prefers an even number of H tiles (>= 2) so both v7x TensorCores get work."""
    x_resident = 2 * NB * (H + 2) * (W_pad + 2) * Cin * cdt_size
    w_resident = 9 * Cin * Cout_p * cdt_size
    fixed = x_resident + w_resident
    feasible = []
    for th in range(1, H + 1):
        if H % th:
            continue
        o_blk = NB * th * W_pad * Cout_p
        per_step = (2 * o_blk * out_size                       # double-buffered out tile
                    + 2 * NB * th * W_pad * 3 * Cin * cdt_size  # per-kh patch + temps
                    + o_blk * 4)                                # f32 accumulator
        if fixed + per_step <= budget_bytes:
            feasible.append(th)
    if not feasible:
        return 1
    even = [th for th in feasible if (H // th) >= 2 and (H // th) % 2 == 0]
    return max(even) if even else max(feasible)


def conv_relu_pallas(x_nchw, weight, bias, *, tile_h=None, batch_block=1,
                     compute_dtype=jnp.bfloat16):
    """Conv2d(k=3, s=1, p=1) + ReLU.

    x_nchw: (N, Cin, H, W)    float32 (PyTorch layout)
    weight: (Cout, Cin, 3, 3) float32 (PyTorch layout)
    bias:   (Cout,)           float32
    compute_dtype: MXU operand dtype (bf16 default; f32 for exact nn.Conv2d numerics;
                   accumulation is always f32).
    returns (N, Cout, H, W)   same dtype as x
    """
    N, Cin, H, W = x_nchw.shape
    Cout = weight.shape[0]
    Cout_p = _round_up(Cout, 128)   # lane-dense output / GEMM N dim
    W_pad = _round_up(W, 8)         # sublane-friendly im2col reshape + output tile
    NB = batch_block
    assert N % NB == 0, "batch_block must divide N"

    cdt = jnp.dtype(compute_dtype)
    out_dt = x_nchw.dtype
    out_size = jnp.dtype(out_dt).itemsize

    tile_budget, vmem_limit = _vmem_budget()
    TH = tile_h if tile_h is not None else _pick_tile_h(
        H, W_pad, Cin, Cout_p, NB, cdt.itemsize, out_size, tile_budget)
    assert H % TH == 0, "tile_h must divide H"
    nTH = H // TH

    # ---- layout glue (kept minimal; see TODO at top of file) ----
    x_nhwc = jnp.transpose(x_nchw, (0, 2, 3, 1)).astype(compute_dtype)   # (N,H,W,Cin)
    x_pad = jnp.pad(x_nhwc, ((0, 0), (1, 1), (1, 1 + W_pad - W), (0, 0)))  # (N,H+2,W_pad+2,Cin)

    # Weights: (Cout,Cin,3,3) -> (3,3,Cin,Cout) -> pad Cout -> (3, 3*Cin, Cout_p)
    w_hwio = jnp.transpose(weight, (2, 3, 1, 0))
    w_hwio = jnp.pad(w_hwio, ((0, 0), (0, 0), (0, 0), (0, Cout_p - Cout)))
    w3 = w_hwio.reshape(3, 3 * Cin, Cout_p).astype(compute_dtype)
    b2 = jnp.pad(bias, (0, Cout_p - Cout)).reshape(1, Cout_p).astype(jnp.float32)

    cost = pl.CostEstimate(
        flops=2 * N * H * W_pad * (9 * Cin) * Cout_p,
        transcendentals=0,
        bytes_accessed=(x_pad.size * cdt.itemsize + w3.size * cdt.itemsize
                        + N * H * W_pad * Cout_p * out_size),
    )

    def run(single_buffer_weights):
        # Weight/bias index maps are constant -> fetched once; Buffered(1) drops the
        # redundant second buffer (big VMEM win for 512-channel layers).
        pm = {"pipeline_mode": pl.Buffered(1)} if single_buffer_weights else {}
        return pl.pallas_call(
            conv3x3_relu_kernel,
            out_shape=jax.ShapeDtypeStruct((N, H * W_pad, Cout_p), out_dt),
            grid_spec=pltpu.PrefetchScalarGridSpec(
                num_scalar_prefetch=0,
                grid=(N // NB, nTH),
                in_specs=[
                    # Full padded image(s) for this batch block; index constant across t
                    # so it is DMA'd once per batch block and stays resident in VMEM.
                    pl.BlockSpec((NB, H + 2, W_pad + 2, Cin),
                                 lambda nb, t: (nb, 0, 0, 0)),
                    pl.BlockSpec((3, 3 * Cin, Cout_p), lambda nb, t: (0, 0, 0), **pm),
                    pl.BlockSpec((1, Cout_p), lambda nb, t: (0, 0), **pm),
                ],
                out_specs=pl.BlockSpec((NB, TH * W_pad, Cout_p),
                                       lambda nb, t: (nb, t, 0)),
            ),
            compiler_params=pltpu.CompilerParams(
                dimension_semantics=("parallel", "parallel"),
                vmem_limit_bytes=vmem_limit,
            ),
            cost_estimate=cost,
        )(x_pad, w3, b2)

    try:
        out = run(True)
    except Exception:
        # Older builds may reject pipeline_mode=pl.Buffered(1); fall back to defaults.
        out = run(False)

    out = out.reshape(N, H, W_pad, Cout_p)[:, :, :W, :Cout]   # drop W / Cout padding
    return jnp.transpose(out, (0, 3, 1, 2)).astype(out_dt)    # back to NCHW


def reference_conv_relu(x_nchw, weight, bias):
    out = jax.lax.conv_general_dilated(
        x_nchw, weight,
        window_strides=(1, 1),
        padding=((1, 1), (1, 1)),
        dimension_numbers=("NCHW", "OIHW", "NCHW"),
    )
    out = out + bias.reshape(1, -1, 1, 1)
    return jnp.maximum(out, 0.0)


if __name__ == "__main__":
    # Small shapes consistent with the module: batch=2, in_channels=4,
    # out_channels=8, spatial=16x16.
    N, Cin, Cout, H, W = 2, 4, 8, 16, 16

    key = jax.random.PRNGKey(0)
    kx, kw, kb = jax.random.split(key, 3)

    x = jax.random.normal(kx, (N, Cin, H, W), dtype=jnp.float32)
    fan_in = Cin * 3 * 3
    bound = 1.0 / (fan_in ** 0.5)
    weight = jax.random.uniform(
        kw, (Cout, Cin, 3, 3), dtype=jnp.float32, minval=-bound, maxval=bound)
    bias = jax.random.uniform(
        kb, (Cout,), dtype=jnp.float32, minval=-bound, maxval=bound)

    ref = reference_conv_relu(x, weight, bias)

    # Exact-numerics path (f32 MXU operands); tile_h=8 exercises the halo-window
    # slicing over a (2 batch) x (2 H-tile) grid.
    out_f32 = conv_relu_pallas(x, weight, bias, tile_h=8,
                               compute_dtype=jnp.float32)
    out_f32 = jax.block_until_ready(out_f32)
    assert out_f32.shape == ref.shape == (N, Cout, H, W)
    assert jnp.allclose(out_f32, ref, atol=1e-4, rtol=1e-4), \
        "f32 path mismatch vs reference conv"

    # Default bf16 MXU operands (f32 accumulation) + batch blocking (grid (1, 2)).
    out_bf16 = conv_relu_pallas(x, weight, bias, tile_h=8, batch_block=2)
    out_bf16 = jax.block_until_ready(out_bf16)
    assert out_bf16.shape == ref.shape
    assert jnp.allclose(out_bf16, ref, atol=5e-2, rtol=5e-2), \
        "bf16 path mismatch vs reference conv"

    print("KERNEL_OK")
</pallas_src>

<mosaic_0001>
module attributes {stable_mosaic.version = 11 : i64} {
  func.func @conv3x3_relu_kernel(%arg0: i32, %arg1: i32, %arg2: memref<1x18x18x4xf32, #tpu.memory_space<vmem>>, %arg3: memref<3x12x128xf32, #tpu.memory_space<vmem>>, %arg4: memref<1x128xf32, #tpu.memory_space<vmem>>, %arg5: memref<1x128x128xf32, #tpu.memory_space<vmem>>) attributes {dimension_semantics = [#tpu.dimension_semantics<parallel>, #tpu.dimension_semantics<parallel>], iteration_bounds = array<i64: 2, 2>, scalar_prefetch = 0 : i64, scratch_operands = 0 : i64, tpu.core_type = #tpu.core_type<tc>, window_params = [{transform_indices = @transform_0, window_bounds = array<i64: 1, 18, 18, 4>}, {pipeline_mode = #tpu.pipeline_mode<synchronous>, transform_indices = @transform_1, window_bounds = array<i64: 3, 12, 128>}, {pipeline_mode = #tpu.pipeline_mode<synchronous>, transform_indices = @transform_2, window_bounds = array<i64: 1, 128>}, {transform_indices = @transform_3, window_bounds = array<i64: 1, 128, 128>}]} {
    %c8_i32 = arith.constant 8 : i32
    %0 = arith.muli %arg1, %c8_i32 : i32
    %cst = arith.constant 0.000000e+00 : f32
    %1 = vector.broadcast %cst : f32 to vector<128x128xf32>
    %c0_i32 = arith.constant 0 : i32
    %2 = arith.addi %0, %c0_i32 : i32
    %c0 = arith.constant 0 : index
    %3 = arith.index_cast %2 : i32 to index
    %c0_0 = arith.constant 0 : index
    %c0_1 = arith.constant 0 : index
    %4 = vector.load %arg2[%c0, %3, %c0_0, %c0_1] : memref<1x18x18x4xf32, #tpu.memory_space<vmem>>, vector<1x8x18x4xf32>
    %5 = vector.extract_strided_slice %4 {offsets = [0, 0, 0, 0], sizes = [1, 8, 16, 4], strides = [1, 1, 1, 1]} : vector<1x8x18x4xf32> to vector<1x8x16x4xf32>
    %6 = vector.extract_strided_slice %4 {offsets = [0, 0, 1, 0], sizes = [1, 8, 16, 4], strides = [1, 1, 1, 1]} : vector<1x8x18x4xf32> to vector<1x8x16x4xf32>
    %7 = vector.extract_strided_slice %4 {offsets = [0, 0, 2, 0], sizes = [1, 8, 16, 4], strides = [1, 1, 1, 1]} : vector<1x8x18x4xf32> to vector<1x8x16x4xf32>
    %8 = tpu.concatenate %5, %6, %7 in 3 : vector<1x8x16x4xf32>, vector<1x8x16x4xf32>, vector<1x8x16x4xf32> -> vector<1x8x16x12xf32>
    %9 = vector.shape_cast %8 : vector<1x8x16x12xf32> to vector<128x12xf32>
    %c0_2 = arith.constant 0 : index
    %c0_3 = arith.constant 0 : index
    %c0_4 = arith.constant 0 : index
    %10 = vector.load %arg3[%c0_2, %c0_3, %c0_4] : memref<3x12x128xf32, #tpu.memory_space<vmem>>, vector<1x12x128xf32>
    %11 = vector.shape_cast %10 : vector<1x12x128xf32> to vector<12x128xf32>
    %cst_5 = arith.constant dense<0.000000e+00> : vector<128x128xf32>
    %12 = tpu.matmul %9, %11, %cst_5 {dimension_numbers = #tpu.dot_dimension_numbers<[1], [0], [0], [1], [0, 0, 1, 1], [], []>} : vector<128x12xf32>, vector<12x128xf32>, vector<128x128xf32> -> vector<128x128xf32>
    %13 = arith.addf %1, %12 : vector<128x128xf32>
    %c1_i32 = arith.constant 1 : i32
    %14 = arith.addi %0, %c1_i32 : i32
    %c0_6 = arith.constant 0 : index
    %15 = arith.index_cast %14 : i32 to index
    %c0_7 = arith.constant 0 : index
    %c0_8 = arith.constant 0 : index
    %16 = vector.load %arg2[%c0_6, %15, %c0_7, %c0_8] : memref<1x18x18x4xf32, #tpu.memory_space<vmem>>, vector<1x8x18x4xf32>
    %17 = vector.extract_strided_slice %16 {offsets = [0, 0, 0, 0], sizes = [1, 8, 16, 4], strides = [1, 1, 1, 1]} : vector<1x8x18x4xf32> to vector<1x8x16x4xf32>
    %18 = vector.extract_strided_slice %16 {offsets = [0, 0, 1, 0], sizes = [1, 8, 16, 4], strides = [1, 1, 1, 1]} : vector<1x8x18x4xf32> to vector<1x8x16x4xf32>
    %19 = vector.extract_strided_slice %16 {offsets = [0, 0, 2, 0], sizes = [1, 8, 16, 4], strides = [1, 1, 1, 1]} : vector<1x8x18x4xf32> to vector<1x8x16x4xf32>
    %20 = tpu.concatenate %17, %18, %19 in 3 : vector<1x8x16x4xf32>, vector<1x8x16x4xf32>, vector<1x8x16x4xf32> -> vector<1x8x16x12xf32>
    %21 = vector.shape_cast %20 : vector<1x8x16x12xf32> to vector<128x12xf32>
    %c1 = arith.constant 1 : index
    %c0_9 = arith.constant 0 : index
    %c0_10 = arith.constant 0 : index
    %22 = vector.load %arg3[%c1, %c0_9, %c0_10] : memref<3x12x128xf32, #tpu.memory_space<vmem>>, vector<1x12x128xf32>
    %23 = vector.shape_cast %22 : vector<1x12x128xf32> to vector<12x128xf32>
    %cst_11 = arith.constant dense<0.000000e+00> : vector<128x128xf32>
    %24 = tpu.matmul %21, %23, %cst_11 {dimension_numbers = #tpu.dot_dimension_numbers<[1], [0], [0], [1], [0, 0, 1, 1], [], []>} : vector<128x12xf32>, vector<12x128xf32>, vector<128x128xf32> -> vector<128x128xf32>
    %25 = arith.addf %13, %24 : vector<128x128xf32>
    %c2_i32 = arith.constant 2 : i32
    %26 = arith.addi %0, %c2_i32 : i32
    %c0_12 = arith.constant 0 : index
    %27 = arith.index_cast %26 : i32 to index
    %c0_13 = arith.constant 0 : index
    %c0_14 = arith.constant 0 : index
    %28 = vector.load %arg2[%c0_12, %27, %c0_13, %c0_14] : memref<1x18x18x4xf32, #tpu.memory_space<vmem>>, vector<1x8x18x4xf32>
    %29 = vector.extract_strided_slice %28 {offsets = [0, 0, 0, 0], sizes = [1, 8, 16, 4], strides = [1, 1, 1, 1]} : vector<1x8x18x4xf32> to vector<1x8x16x4xf32>
    %30 = vector.extract_strided_slice %28 {offsets = [0, 0, 1, 0], sizes = [1, 8, 16, 4], strides = [1, 1, 1, 1]} : vector<1x8x18x4xf32> to vector<1x8x16x4xf32>
    %31 = vector.extract_strided_slice %28 {offsets = [0, 0, 2, 0], sizes = [1, 8, 16, 4], strides = [1, 1, 1, 1]} : vector<1x8x18x4xf32> to vector<1x8x16x4xf32>
    %32 = tpu.concatenate %29, %30, %31 in 3 : vector<1x8x16x4xf32>, vector<1x8x16x4xf32>, vector<1x8x16x4xf32> -> vector<1x8x16x12xf32>
    %33 = vector.shape_cast %32 : vector<1x8x16x12xf32> to vector<128x12xf32>
    %c2 = arith.constant 2 : index
    %c0_15 = arith.constant 0 : index
    %c0_16 = arith.constant 0 : index
    %34 = vector.load %arg3[%c2, %c0_15, %c0_16] : memref<3x12x128xf32, #tpu.memory_space<vmem>>, vector<1x12x128xf32>
    %35 = vector.shape_cast %34 : vector<1x12x128xf32> to vector<12x128xf32>
    %cst_17 = arith.constant dense<0.000000e+00> : vector<128x128xf32>
    %36 = tpu.matmul %33, %35, %cst_17 {dimension_numbers = #tpu.dot_dimension_numbers<[1], [0], [0], [1], [0, 0, 1, 1], [], []>} : vector<128x12xf32>, vector<12x128xf32>, vector<128x128xf32> -> vector<128x128xf32>
    %37 = arith.addf %25, %36 : vector<128x128xf32>
    %c0_18 = arith.constant 0 : index
    %c0_19 = arith.constant 0 : index
    %38 = vector.load %arg4[%c0_18, %c0_19] : memref<1x128xf32, #tpu.memory_space<vmem>>, vector<1x128xf32>
    %39 = vector.broadcast %38 : vector<1x128xf32> to vector<128x128xf32>
    %40 = arith.addf %37, %39 : vector<128x128xf32>
    %cst_20 = arith.constant 0.000000e+00 : f32
    %41 = vector.broadcast %cst_20 : f32 to vector<128x128xf32>
    %42 = arith.maximumf %40, %41 : vector<128x128xf32>
    %43 = vector.shape_cast %42 : vector<128x128xf32> to vector<1x128x128xf32>
    %c0_21 = arith.constant 0 : index
    %c0_22 = arith.constant 0 : index
    %c0_23 = arith.constant 0 : index
    %44 = vector.load %arg5[%c0_21, %c0_22, %c0_23] : memref<1x128x128xf32, #tpu.memory_space<vmem>>, vector<1x128x128xf32>
    tpu.vector_store %arg5[%c0_21, %c0_22, %c0_23], %43 {strides = array<i32>} : memref<1x128x128xf32, #tpu.memory_space<vmem>>, vector<1x128x128xf32>,
    return
  }
  func.func @transform_0(%arg0: i32, %arg1: i32) -> (i32, i32, i32, i32) {
    %c0_i32 = arith.constant 0 : i32
    %c0_i32_0 = arith.constant 0 : i32
    %c0_i32_1 = arith.constant 0 : i32
    %c0_i32_2 = arith.constant 0 : i32
    return %arg0, %c0_i32, %c0_i32_0, %c0_i32_1 : i32, i32, i32, i32
  }
  func.func @transform_1(%arg0: i32, %arg1: i32) -> (i32, i32, i32) {
    %c0_i32 = arith.constant 0 : i32
    %c0_i32_0 = arith.constant 0 : i32
    %c0_i32_1 = arith.constant 0 : i32
    %c0_i32_2 = arith.constant 0 : i32
    return %c0_i32, %c0_i32_0, %c0_i32_1 : i32, i32, i32
  }
  func.func @transform_2(%arg0: i32, %arg1: i32) -> (i32, i32) {
    %c0_i32 = arith.constant 0 : i32
    %c0_i32_0 = arith.constant 0 : i32
    %c0_i32_1 = arith.constant 0 : i32
    return %c0_i32, %c0_i32_0 : i32, i32
  }
  func.func @transform_3(%arg0: i32, %arg1: i32) -> (i32, i32, i32) {
    %c0_i32 = arith.constant 0 : i32
    %c0_i32_0 = arith.constant 0 : i32
    return %arg0, %arg1, %c0_i32 : i32, i32, i32
  }
}

module attributes {stable_mosaic.version = 11 : i64} {
  func.func @conv3x3_relu_kernel(%arg0: i32, %arg1: i32, %arg2: memref<1x18x18x4xf32, #tpu.memory_space<vmem>>, %arg3: memref<3x12x128xf32, #tpu.memory_space<vmem>>, %arg4: memref<1x128xf32, #tpu.memory_space<vmem>>, %arg5: memref<1x128x128xf32, #tpu.memory_space<vmem>>) attributes {dimension_semantics = [#tpu.dimension_semantics<parallel>, #tpu.dimension_semantics<parallel>], iteration_bounds = array<i64: 2, 2>, scalar_prefetch = 0 : i64, scratch_operands = 0 : i64, tpu.core_type = #tpu.core_type<tc>, window_params = [{transform_indices = @transform_0, window_bounds = array<i64: 1, 18, 18, 4>}, {pipeline_mode = #tpu.pipeline_mode<synchronous>, transform_indices = @transform_1, window_bounds = array<i64: 3, 12, 128>}, {pipeline_mode = #tpu.pipeline_mode<synchronous>, transform_indices = @transform_2, window_bounds = array<i64: 1, 128>}, {transform_indices = @transform_3, window_bounds = array<i64: 1, 128, 128>}]} {
    %c8_i32 = arith.constant 8 : i32
    %0 = arith.muli %arg1, %c8_i32 : i32
    %cst = arith.constant 0.000000e+00 : f32
    %1 = vector.broadcast %cst : f32 to vector<128x128xf32>
    %c0_i32 = arith.constant 0 : i32
    %2 = arith.addi %0, %c0_i32 : i32
    %c0 = arith.constant 0 : index
    %3 = arith.index_cast %2 : i32 to index
    %c0_0 = arith.constant 0 : index
    %c0_1 = arith.constant 0 : index
    %4 = vector.load %arg2[%c0, %3, %c0_0, %c0_1] : memref<1x18x18x4xf32, #tpu.memory_space<vmem>>, vector<1x8x18x4xf32>
    %5 = vector.extract_strided_slice %4 {offsets = [0, 0, 0, 0], sizes = [1, 8, 16, 4], strides = [1, 1, 1, 1]} : vector<1x8x18x4xf32> to vector<1x8x16x4xf32>
    %6 = vector.extract_strided_slice %4 {offsets = [0, 0, 1, 0], sizes = [1, 8, 16, 4], strides = [1, 1, 1, 1]} : vector<1x8x18x4xf32> to vector<1x8x16x4xf32>
    %7 = vector.extract_strided_slice %4 {offsets = [0, 0, 2, 0], sizes = [1, 8, 16, 4], strides = [1, 1, 1, 1]} : vector<1x8x18x4xf32> to vector<1x8x16x4xf32>
    %8 = tpu.concatenate %5, %6, %7 in 3 : vector<1x8x16x4xf32>, vector<1x8x16x4xf32>, vector<1x8x16x4xf32> -> vector<1x8x16x12xf32>
    %9 = vector.shape_cast %8 : vector<1x8x16x12xf32> to vector<128x12xf32>
    %c0_2 = arith.constant 0 : index
    %c0_3 = arith.constant 0 : index
    %c0_4 = arith.constant 0 : index
    %10 = vector.load %arg3[%c0_2, %c0_3, %c0_4] : memref<3x12x128xf32, #tpu.memory_space<vmem>>, vector<1x12x128xf32>
    %11 = vector.shape_cast %10 : vector<1x12x128xf32> to vector<12x128xf32>
    %cst_5 = arith.constant dense<0.000000e+00> : vector<128x128xf32>
    %12 = tpu.matmul %9, %11, %cst_5 {dimension_numbers = #tpu.dot_dimension_numbers<[1], [0], [0], [1], [0, 0, 1, 1], [], []>} : vector<128x12xf32>, vector<12x128xf32>, vector<128x128xf32> -> vector<128x128xf32>
    %13 = arith.addf %1, %12 : vector<128x128xf32>
    %c1_i32 = arith.constant 1 : i32
    %14 = arith.addi %0, %c1_i32 : i32
    %c0_6 = arith.constant 0 : index
    %15 = arith.index_cast %14 : i32 to index
    %c0_7 = arith.constant 0 : index
    %c0_8 = arith.constant 0 : index
    %16 = vector.load %arg2[%c0_6, %15, %c0_7, %c0_8] : memref<1x18x18x4xf32, #tpu.memory_space<vmem>>, vector<1x8x18x4xf32>
    %17 = vector.extract_strided_slice %16 {offsets = [0, 0, 0, 0], sizes = [1, 8, 16, 4], strides = [1, 1, 1, 1]} : vector<1x8x18x4xf32> to vector<1x8x16x4xf32>
    %18 = vector.extract_strided_slice %16 {offsets = [0, 0, 1, 0], sizes = [1, 8, 16, 4], strides = [1, 1, 1, 1]} : vector<1x8x18x4xf32> to vector<1x8x16x4xf32>
    %19 = vector.extract_strided_slice %16 {offsets = [0, 0, 2, 0], sizes = [1, 8, 16, 4], strides = [1, 1, 1, 1]} : vector<1x8x18x4xf32> to vector<1x8x16x4xf32>
    %20 = tpu.concatenate %17, %18, %19 in 3 : vector<1x8x16x4xf32>, vector<1x8x16x4xf32>, vector<1x8x16x4xf32> -> vector<1x8x16x12xf32>
    %21 = vector.shape_cast %20 : vector<1x8x16x12xf32> to vector<128x12xf32>
    %c1 = arith.constant 1 : index
    %c0_9 = arith.constant 0 : index
    %c0_10 = arith.constant 0 : index
    %22 = vector.load %arg3[%c1, %c0_9, %c0_10] : memref<3x12x128xf32, #tpu.memory_space<vmem>>, vector<1x12x128xf32>
    %23 = vector.shape_cast %22 : vector<1x12x128xf32> to vector<12x128xf32>
    %cst_11 = arith.constant dense<0.000000e+00> : vector<128x128xf32>
    %24 = tpu.matmul %21, %23, %cst_11 {dimension_numbers = #tpu.dot_dimension_numbers<[1], [0], [0], [1], [0, 0, 1, 1], [], []>} : vector<128x12xf32>, vector<12x128xf32>, vector<128x128xf32> -> vector<128x128xf32>
    %25 = arith.addf %13, %24 : vector<128x128xf32>
    %c2_i32 = arith.constant 2 : i32
    %26 = arith.addi %0, %c2_i32 : i32
    %c0_12 = arith.constant 0 : index
    %27 = arith.index_cast %26 : i32 to index
    %c0_13 = arith.constant 0 : index
    %c0_14 = arith.constant 0 : index
    %28 = vector.load %arg2[%c0_12, %27, %c0_13, %c0_14] : memref<1x18x18x4xf32, #tpu.memory_space<vmem>>, vector<1x8x18x4xf32>
    %29 = vector.extract_strided_slice %28 {offsets = [0, 0, 0, 0], sizes = [1, 8, 16, 4], strides = [1, 1, 1, 1]} : vector<1x8x18x4xf32> to vector<1x8x16x4xf32>
    %30 = vector.extract_strided_slice %28 {offsets = [0, 0, 1, 0], sizes = [1, 8, 16, 4], strides = [1, 1, 1, 1]} : vector<1x8x18x4xf32> to vector<1x8x16x4xf32>
    %31 = vector.extract_strided_slice %28 {offsets = [0, 0, 2, 0], sizes = [1, 8, 16, 4], strides = [1, 1, 1, 1]} : vector<1x8x18x4xf32> to vector<1x8x16x4xf32>
    %32 = tpu.concatenate %29, %30, %31 in 3 : vector<1x8x16x4xf32>, vector<1x8x16x4xf32>, vector<1x8x16x4xf32> -> vector<1x8x16x12xf32>
    %33 = vector.shape_cast %32 : vector<1x8x16x12xf32> to vector<128x12xf32>
    %c2 = arith.constant 2 : index
    %c0_15 = arith.constant 0 : index
    %c0_16 = arith.constant 0 : index
    %34 = vector.load %arg3[%c2, %c0_15, %c0_16] : memref<3x12x128xf32, #tpu.memory_space<vmem>>, vector<1x12x128xf32>
    %35 = vector.shape_cast %34 : vector<1x12x128xf32> to vector<12x128xf32>
    %cst_17 = arith.constant dense<0.000000e+00> : vector<128x128xf32>
    %36 = tpu.matmul %33, %35, %cst_17 {dimension_numbers = #tpu.dot_dimension_numbers<[1], [0], [0], [1], [0, 0, 1, 1], [], []>} : vector<128x12xf32>, vector<12x128xf32>, vector<128x128xf32> -> vector<128x128xf32>
    %37 = arith.addf %25, %36 : vector<128x128xf32>
    %c0_18 = arith.constant 0 : index
    %c0_19 = arith.constant 0 : index
    %38 = vector.load %arg4[%c0_18, %c0_19] : memref<1x128xf32, #tpu.memory_space<vmem>>, vector<1x128xf32>
    %39 = vector.broadcast %38 : vector<1x128xf32> to vector<128x128xf32>
    %40 = arith.addf %37, %39 : vector<128x128xf32>
    %cst_20 = arith.constant 0.000000e+00 : f32
    %41 = vector.broadcast %cst_20 : f32 to vector<128x128xf32>
    %42 = arith.maximumf %40, %41 : vector<128x128xf32>
    %43 = vector.shape_cast %42 : vector<128x128xf32> to vector<1x128x128xf32>
    %c0_21 = arith.constant 0 : index
    %c0_22 = arith.constant 0 : index
    %c0_23 = arith.constant 0 : index
    %44 = vector.load %arg5[%c0_21, %c0_22, %c0_23] : memref<1x128x128xf32, #tpu.memory_space<vmem>>, vector<1x128x128xf32>
    tpu.vector_store %arg5[%c0_21, %c0_22, %c0_23], %43 {strides = array<i32>} : memref<1x128x128xf32, #tpu.memory_space<vmem>>, vector<1x128x128xf32>,
    return
  }
  func.func @transform_0(%arg0: i32, %arg1: i32) -> (i32, i32, i32, i32) {
    %c0_i32 = arith.constant 0 : i32
    %c0_i32_0 = arith.constant 0 : i32
    %c0_i32_1 = arith.constant 0 : i32
    %c0_i32_2 = arith.constant 0 : i32
    return %arg0, %c0_i32, %c0_i32_0, %c0_i32_1 : i32, i32, i32, i32
  }
  func.func @transform_1(%arg0: i32, %arg1: i32) -> (i32, i32, i32) {
    %c0_i32 = arith.constant 0 : i32
    %c0_i32_0 = arith.constant 0 : i32
    %c0_i32_1 = arith.constant 0 : i32
    %c0_i32_2 = arith.constant 0 : i32
    return %c0_i32, %c0_i32_0, %c0_i32_1 : i32, i32, i32
  }
  func.func @transform_2(%arg0: i32, %arg1: i32) -> (i32, i32) {
    %c0_i32 = arith.constant 0 : i32
    %c0_i32_0 = arith.constant 0 : i32
    %c0_i32_1 = arith.constant 0 : i32
    return %c0_i32, %c0_i32_0 : i32, i32
  }
  func.func @transform_3(%arg0: i32, %arg1: i32) -> (i32, i32, i32) {
    %c0_i32 = arith.constant 0 : i32
    %c0_i32_0 = arith.constant 0 : i32
    return %arg0, %arg1, %c0_i32 : i32, i32, i32
  }
}

</mosaic_0001>

<bundles_post_ra>
// kernel: tpu_custom_call.1
= control target key start
LH: loop header
LB: loop body
LE: loop exit
PB: predicated region body
PF: predicated region fallthrough
CT: control target
= control target key end

     0   :  { %8 = vsyncpa [#allocation3], 0  ;;  %s3232_s0 = inlined_call_operand.vmem [shape: f32[2,18,18,4], index: 0, kind: input, shape index: {}]   ;;  %s3233_s1 = inlined_call_operand.vmem [shape: f32[3,12,128], index: 1, kind: input, shape index: {}]   ;;  %s3234_s2 = inlined_call_operand.vmem [shape: f32[1,128], index: 2, kind: input, shape index: {}]   ;;  %s3235_s3 = inlined_call_operand.hbm [shape: f32[2,256,128], index: 3, kind: output, shape index: {}]  }
   0x1   :  { %10 = vsyncpa [#allocation3 + $0x1], 0  ;;  %s2246_s12 = smov 0   ;;  %s2248_s13 = smov 0  }
   0x2   :  { %s2250_s14 = smov 0   ;;  %s2252_s15 = smov 0  }
   0x3   :  { %s2254_s16 = smov 0   ;;  %s2256_s17 = smov 0  }
   0x4   :  { %s2258_s18 = smov 0   ;;  %s2260_s19 = smov 0  }
   0x5 LB: > { %s1736_s20 = sadd.s32 4294967295, %s2219_s19   ;;  %s1737_s21 = sadd.s32 4294967294, %s2219_s19   ;;  %s2219_s19 = sphi %s2260_s19, %s16_s19   ;;  %s2215_s18 = sphi %s2258_s18, %s3288_s18   ;;  %s2211_s17 = sphi %s2256_s17, %s3287_s17   ;;  %s2207_s16 = sphi %s2254_s16, %s3286_s16   ;;  %s2203_s15 = sphi %s2252_s15, %s3285_s15   ;;  %s2199_s14 = sphi %s2250_s14, %s3284_s14   ;;  %s2195_s13 = sphi %s2248_s13, %s3283_s13   ;;  %s2191_s12 = sphi %s2246_s12, %s3282_s12  }
   0x6   : > { %s25_s22 = sadd.s32 1, %s2211_s17  ;;  %s28_s23 = sadd.s32 1, %s2215_s18 }
   0x7   : > { %p26_p0 = scmp.ge.s32.totalorder %s25_s22, 2  ;;  %p115_p1 = scmp.ne.s32.totalorder %s2199_s14, %s2195_s13 }
   0x8   : > { %p116_p2 = scmp.eq.s32.totalorder %s1736_s20, 3  ;;  %p121_p5 = scmp.ne.s32.totalorder %s2195_s13, %s2191_s12 }
   0x9   : > { %s3290_s22 = smov (%p26_p0, %s25_s22), 0  ;;  %s3292_s23 = smov (!%p26_p0, %s28_s23), %s2215_s18 }
   0xa   : > { %s101_s24 = ssub.s32 %s2211_s17, %s3290_s22  ;;  %p2297_p3 = por %p116_p2, %p115_p1 }
   0xb   : > { %p30_p4 = scmp.ge.s32.totalorder %s3292_s23, 2  ;;  %p122_p6 = scmp.eq.s32.totalorder %s1737_s21, 3 }
   0xc   : > { %p1740_p7 = scmp.ge.s32.totalorder %s2219_s19, 1  ;;  %p154_p9 = scmp.lt.s32.totalorder %s2219_s19, 5 }
   0xd   : > { %s3294_s23 = smov (%p30_p4, %s3292_s23), 0  ;;  %p2306_p8 = por %p122_p6, %p121_p5 }
   0xe   : > { %s100_s27 = ssub.s32 %s2215_s18, %s3294_s23  ;;  %s105_s28 = sadd.s32 1, %s2199_s14 }
   0xf   : > { %s102_s29 = sor.u32 %s101_s24, %s100_s27  ;;  %p155_p10 = pnand %p1740_p7, %p154_p9 }
  0x10   : > { %p103_p11 = scmp.eq.s32.totalorder %s102_s29, 0 }
  0x11   : > { %158 = sbr.rel (%p155_p10) target bundleno = 574 (0x23e), region = 32 }
  0x12   : > { %s2315_s30 = scalar_select %p103_p11, %s2199_s14, %s105_s28  }
  0x18   : > { %p178_p12 = scmp.lt.s32.totalorder %s2207_s16, 1  ;;  %s1744_s5 = smul.u32 192, %s2203_s15  ;;  %v1771_v0 = vld [vmem:[%s3233_s1 + $0x10] sm:$0xff]  ;;  %v1772_v1 = vld [vmem:[%s3233_s1 + $0x18] sm:$0xf]  ;;  %v447_v2 = vld [vmem:[%s3233_s1] sm:$0xff] }
  0x19   : > { %vm760_vm0 = vcmask 1043456   ;;  %v1997_v3 = vpack.c.bf16 %v1772_v1, %v1771_v0  ;;  %v448_v4 = vld [vmem:[%s3233_s1 + $0x8] sm:$0xf]  ;;  %vm235_vm1 = vcmask 1046528   ;;  %vm2221_vm2 = vmmov 1   ;;  %s175_s11 = sand.u32 1, %s2195_s13  }
  0x1a   : > { %s179_s4 = scalar_select %p178_p12, %s2207_s16, 1  ;;  %v2344_v8 = vpack.c.bf16 %v448_v4, %v447_v2  ;;  %vm2356_vm3 = vmpackc.low %vm760_vm0, %vm2221_vm2  ;;  %vm324_vm4 = vcmask 1045504   ;;  %vm413_vm5 = vcmask 31744   ;;  %vm430_vm6 = vcmask 64512  }
  0x1b   : > { %1999 = vmatprep.subr.msk.bf16.mxu1 %vm2356_vm3, %v1997_v3  ;;  %vm711_vm7 = vcmask 97280   ;;  %s1741_s24 = sshll.u32 %s175_s11, 7  ;;  %s1855_s29 = sshll.u32 %s2207_s16, 5 }
  0x1c   : > { %s2049_s6 = smul.u32 432, %s179_s4  ;;  %2005 = vmatprep.subr.msk.bf16.mxu0 %vm2356_vm3, %v2344_v8  ;;  %2002 = vmatpush3.bf16.msk.msra.mxu1 %vm2356_vm3, %v1997_v3  ;;  %s3135_s27 = scalar_lea.vmem [#allocation2], %s1741_s24 }
  0x1d   : > { %2008 = vmatpush3.bf16.msk.msra.mxu0 %vm2356_vm3, %v2344_v8  ;;  %2015 = vmatprep.subr.msk.bf16.mxu1 %vm2356_vm3, %v2344_v8  ;;  %s1650_s7 = sshll.u32 %s3135_s27, 4  ;;  %s2224_s20 = smov [#allocation2]   ;;  %s3173_s7 = int_to_ptr.vmem [resolvable:$true] %s1650_s7 }
  0x1e   : > { %s182_s9 = scalar_lea.vmem %s3232_s0, %s2049_s6  ;;  %s2223_s6 = smov 8  }
  0x1f   : > { %s2332_s28 = scalar_lea.vmem %s182_s9, %s1744_s5  ;;  %s2222_s5 = smov 4  }
  0x20   : > { %v2338_v5 = vld [vmem:[%s2332_s28 + $0x8] sm:$0xff]  ;;  %v189_v6 = vld [vmem:[%s2332_s28 + $0x10] sm:$0x3]  ;;  %v2342_v7 = vld [vmem:[%s2332_s28] sm:$0xff]  ;;  %s3179_s9 = scalar_lea.sflag [#allocation3], %s175_s11  ;;  %s2125_s10 = scalar_lea.vmem %s3173_s7, 2048 }
  0x21   : > { %v237_v9 = vrot.slane %v2338_v5, 1  ;;  %v239_v10 = vrot.slane %v189_v6, 1  ;;  %v236_v11 = vrot.slane %v2342_v7, 1  ;;  %v325_v12 = vrot.slane %v2342_v7, 2  ;;  %v2350_v13 = vld [vmem:[%s2332_s28 + $0x18] sm:$0xff]  ;;  %v2353_v14 = vld [vmem:[%s2332_s28 + $0x20] sm:$0xff]  ;;  %p2126_p13 = scmp.ne.s32.totalorder %s3173_s7, %s2125_s10 }
  0x22   : > { %v326_v16 = vrot.slane %v2338_v5, 2  ;;  %v500_v17 = vrot.slane %v2350_v13, 1  ;;  %v501_v18 = vrot.slane %v2353_v14, 1  ;;  %v1749_v19 = vld [vmem:[%s2332_s28 + $0x28] sm:$0x3]  ;;  %v588_v22 = vrot.slane %v2350_v13, 2 }
  0x23   : > { %v240_v20 = vsel %vm235_vm1, %v237_v9, %v239_v10  ;;  %v238_v21 = vsel %vm235_vm1, %v236_v11, %v237_v9  ;;  %v2382_v25 = vrot.slane %v2353_v14, 2  ;;  %v503_v26 = vrot.slane %v1749_v19, 1  ;;  %v2395_v31 = vld [vmem:[%s2332_s28 + $0x30] sm:$0xff]  ;;  %v2398_v32 = vld [vmem:[%s2332_s28 + $0x38] sm:$0xff]  ;;  %v2404_v33 = vld [vmem:[%s2332_s28 + $0x28] sm:$0x3]  ;;  %p2127_p0 = pnand %p2126_p13, %p2297_p3 }
  0x24   : > { %278 = vrot.lane.b32.xlu1 %v240_v20, %s2222_s5  ;;  %276 = vrot.lane.b32.xlu0 %v238_v21, %s2222_s5  ;;  %v327_v23 = vsel %vm324_vm4, %v325_v12, %v326_v16  ;;  %v502_v24 = vsel %vm235_vm1, %v500_v17, %v501_v18  ;;  %v591_v29 = vrot.slane %v1749_v19, 2  ;;  %v328_v30 = vrot.slane %v189_v6, 2  ;;  %v2414_v38 = vld [vmem:[%s2332_s28 + $0x40] sm:$0x3]  ;;  %v1761_v40 = vld [vmem:[%s2332_s28 + $0x88] sm:$0x3] }
  0x25   : > { %v2391_v27 = vsel %vm324_vm4, %v588_v22, %v2382_v25  ;;  %v504_v28 = vsel %vm235_vm1, %v501_v18, %v503_v26  ;;  %v505_v36 = vrot.slane %v2395_v31, 1  ;;  %v2411_v37 = vrot.slane %v2398_v32, 1  ;;  %v2417_v39 = vld [vmem:[%s2332_s28 + $0x80] sm:$0xff]  ;;  %v2430_v46 = vld [vmem:[%s2332_s28 + $0x50] sm:$0xff]  ;;  %v2441_v51 = vld [vmem:[%s2332_s28 + $0x98] sm:$0xff]  ;;  %p2128_p1 = pneg %p2127_p0  ;;  %s2129_s21 = sshll.u32 %s2224_s20, 4  ;;  %s2130_s21 = int_to_ptr.vmem [resolvable:$false] %s2129_s21 }
  0x26   : > { %v592_v34 = vsel %vm324_vm4, %v2382_v25, %v591_v29  ;;  %v329_v35 = vsel %vm324_vm4, %v326_v16, %v328_v30  ;;  %3255 = vst [vmem:[#allocation5_spill] sm:$0xff] %v2417_v39  ;;  %v244_v41 = vrot.slane %v2404_v33, 1  ;;  %v1811_v42 = vld [vmem:[%s2332_s28 + $0x40] sm:$0x3]  ;;  %v593_v43 = vrot.slane %v2395_v31, 2  ;;  %3256 = vst [vmem:[#allocation6_spill] sm:$0xff] %v2430_v46  ;;  %p2132_p2 = scmp.lt.s32.totalorder %s3173_s7, %s2130_s21 }
  0x27   : > { %v2426_v44 = vrot.slane %v2398_v32, 2  ;;  %v508_v45 = vrot.slane %v2414_v38, 1  ;;  %v2434_v47 = vsel %vm235_vm1, %v505_v36, %v2411_v37  ;;  %v596_v48 = vrot.slane %v2414_v38, 2  ;;  %3257 = vst [vmem:[#allocation7_spill] sm:$0xff] %v2441_v51  ;;  %v1764_v52 = vld [vmem:[%s2332_s28 + $0xa0] sm:$0x3] }
  0x28   : > { %365 = vrot.lane.b32.xlu1 %v327_v23, %s2223_s6  ;;  %540 = vrot.lane.b32.xlu0 %v502_v24, %s2222_s5  ;;  %v2438_v49 = vrot.slane %v2417_v39, 1  ;;  %v523_v50 = vrot.slane %v1761_v40, 1  ;;  %v2445_v53 = vrot.slane %v2417_v39, 2  ;;  %v1159_v54 = vrot.slane %v1811_v42, 1  ;;  %v1814_v57 = vld [vmem:[%s2332_s28 + $0x58] sm:$0x3] }
  0x29   : > { %v1247_v55 = vrot.slane %v1811_v42, 2  ;;  %v611_v56 = vrot.slane %v1761_v40, 2  ;;  %v245_v58 = vsel %vm235_vm1, %v501_v18, %v244_v41  ;;  %v333_v59 = vrot.slane %v2404_v33, 2  ;;  %v2464_v63 = vld [vmem:[%s2332_s28 + $0x68] sm:$0xff]  ;;  %v2479_v3 = vld [vmem:[%s2332_s28 + $0xb0] sm:$0xff]  ;;  %s2131_s24 = scalar_lea.vmem %s2130_s21, 4096 }
  0x2a   : > { %v2451_v60 = vrot.slane %v2430_v46, 1  ;;  %v2455_v61 = vsel %vm235_vm1, %v2438_v49, %v523_v50  ;;  %v2461_v62 = vrot.slane %v2430_v46, 2  ;;  %3258 = vst [vmem:[#allocation8_spill] sm:$0xff] %v2464_v63  ;;  %v2468_v0 = vsel %vm235_vm1, %v2411_v37, %v1159_v54  ;;  %3259 = vst [vmem:[#allocation9_spill] sm:$0xff] %v2479_v3  ;;  %v1767_v11 = vld [vmem:[%s2332_s28 + $0xb8] sm:$0x3]  ;;  %p2133_p4 = scmp.lt.s32.totalorder %s2131_s24, %s2125_s10 }
  0x2b   : > { %v2472_v1 = vsel %vm324_vm4, %v2426_v44, %v1247_v55  ;;  %v2476_v2 = vsel %vm324_vm4, %v2445_v53, %v611_v56  ;;  %v2482_v4 = vrot.slane %v2441_v51, 1  ;;  %v528_v6 = vrot.slane %v1764_v52, 1  ;;  %v1817_v19 = vld [vmem:[%s2332_s28 + $0x70] sm:$0x3]  ;;  %v2496_v20 = vld [vmem:[%s2332_s28 + $0x48] sm:$0xff] }
  0x2c   : > { %628 = vrot.lane.b32.xlu1 %v2391_v27, %s2223_s6  ;;  %542 = vrot.lane.b32.xlu0 %v504_v28, %s2222_s5  ;;  %v1164_v9 = vrot.slane %v1814_v57, 1  ;;  %v1252_v10 = vrot.slane %v1814_v57, 2  ;;  %v2487_v12 = vsel %vm324_vm4, %v593_v43, %v2426_v44  ;;  %v509_v16 = vsel %vm235_vm1, %v2411_v37, %v508_v45  ;;  %v2527_v33 = vld [vmem:[%s2332_s28 + $0xc8] sm:$0xff]  ;;  %v201_v45 = vld [vmem:[%s2332_s28 + $0x70] sm:$0x3]  ;;  %p2134_p5 = por %p2133_p4, %p2132_p2 }
  0x2d   : > { %v2492_v17 = vrot.slane %v2441_v51, 2  ;;  %v616_v18 = vrot.slane %v1764_v52, 2  ;;  %v2499_v21 = vrot.slane %v2464_v63, 1  ;;  %v2503_v22 = vsel %vm235_vm1, %v2482_v4, %v528_v6  ;;  %3260 = vst [vmem:[#allocation10_spill] sm:$0xff] %v2527_v33  ;;  %v1820_v40 = vld [vmem:[%s2332_s28 + $0x88] sm:$0x3] }
  0x2e   : > { %v2507_v23 = vsel %vm235_vm1, %v2451_v60, %v1164_v9  ;;  %v2517_v26 = vrot.slane %v2464_v63, 2  ;;  %v2524_v29 = vrot.slane %v2479_v3, 1  ;;  %v533_v30 = vrot.slane %v1767_v11, 1  ;;  %v1823_v50 = vld [vmem:[%s2332_s28 + $0xa0] sm:$0x3]  ;;  %p2135_p6 = pnand %p2134_p5, %p2128_p1 }
  0x2f   : > { %v2521_v28 = vsel %vm324_vm4, %v2492_v17, %v616_v18  ;;  %v1257_v36 = vrot.slane %v1817_v19, 2  ;;  %v621_v38 = vrot.slane %v1767_v11, 2  ;;  %v597_v41 = vsel %vm324_vm4, %v2426_v44, %v596_v48  ;;  %v1826_v18 = vld [vmem:[%s2332_s28 + $0xb8] sm:$0x3]  ;;  %v1829_v39 = vld [vmem:[%s2332_s28 + $0xd0] sm:$0x3] }
  0x30   : > { %630 = vrot.lane.b32.xlu1 %v592_v34, %s2223_s6  ;;  %367 = vrot.lane.b32.xlu0 %v329_v35, %s2223_s6  ;;  %v1770_v34 = vld [vmem:[%s2332_s28 + $0xd0] sm:$0x3]  ;;  %v1169_v35 = vrot.slane %v1817_v19, 1  ;;  %v510_v42 = vrot.slane %v2496_v20, 1  ;;  %v2539_v43 = vsel %vm235_vm1, %v2524_v29, %v533_v30  ;;  %v334_v52 = vsel %vm324_vm4, %v2382_v25, %v333_v59  ;;  %v204_v59 = vld [vmem:[%s2332_s28 + $0x88] sm:$0x3] }
  0x31   : > { %v2551_v48 = vsel %vm324_vm4, %v2517_v26, %v1257_v36  ;;  %v2561_v25 = vrot.slane %v2527_v33, 1  ;;  %v538_v56 = vrot.slane %v1770_v34, 1  ;;  %v1174_v57 = vrot.slane %v1820_v40, 1  ;;  %v195_v19 = vld [vmem:[%s2332_s28 + $0x40] sm:$0x3] }
  0x32   : > { %v2547_v54 = vsel %vm235_vm1, %v2499_v21, %v1169_v35  ;;  %v2565_v6 = vrot.slane %v2527_v33, 2  ;;  %v626_v9 = vrot.slane %v1770_v34, 2  ;;  %v1179_v11 = vrot.slane %v1823_v50, 1  ;;  %v2647_v63 = vld [vmem:[%s2332_s28 + $0x60] sm:$0xff] }
  0x33   : > { %v2571_v30 = vsel %vm235_vm1, %v2561_v25, %v538_v56  ;;  %v1267_v36 = vrot.slane %v1823_v50, 2  ;;  %v348_v56 = vrot.slane %v201_v45, 2  ;;  %v249_v33 = vrot.slane %v195_v19, 1  ;;  %3264 = vst [vmem:[#allocation14_spill] sm:$0xff] %v2647_v63 }
  0x34   : > { %544 = vrot.lane.b32.xlu1 %v2434_v47, %s2222_s5  ;;  %280 = vrot.lane.b32.xlu0 %v502_v24, %s2222_s5  ;;  %v2511_v24 = vsel %vm324_vm4, %v2461_v62, %v1252_v10  ;;  %v259_v10 = vrot.slane %v201_v45, 1  ;;  %v2583_v34 = vsel %vm324_vm4, %v2565_v6, %v626_v9  ;;  %v1272_v9 = vrot.slane %v1826_v18, 2 }
  0x35   : > { %v2597_v50 = vsel %vm324_vm4, %v2492_v17, %v1267_v36  ;;  %v2605_v45 = vsel %vm324_vm4, %v2517_v26, %v348_v56  ;;  %v598_v56 = vrot.slane %v2496_v20, 2  ;;  %v338_v51 = vrot.slane %v195_v19, 2 }
  0x36   : > { %v1189_v46 = vrot.slane %v1829_v39, 1 }
  0x37   : > { %v339_v19 = vsel %vm324_vm4, %v2426_v44, %v338_v51 }
  0x38   : > { %369 = vrot.lane.b32.xlu1 %v2391_v27, %s2223_s6  ;;  %282 = vrot.lane.b32.xlu0 %v245_v58, %s2222_s5  ;;  %v2531_v27 = vrot.slane %v2479_v3, 2  ;;  %v1262_v58 = vrot.slane %v1820_v40, 2  ;;  %v2591_v40 = vsel %vm235_vm1, %v2482_v4, %v1179_v11  ;;  %v1755_v11 = vld [vmem:[%s2332_s28 + $0x58] sm:$0x3]  ;;  %v2641_v3 = vsel %vm324_vm4, %v598_v56, %v2461_v62 }
  0x3a   : > { %v2555_v55 = vsel %vm324_vm4, %v2531_v27, %v621_v38  ;;  %v2579_v35 = vsel %vm324_vm4, %v2445_v53, %v1262_v58  ;;  %v2587_v38 = vsel %vm235_vm1, %v2499_v21, %v259_v10  ;;  %v1184_v58 = vrot.slane %v1826_v18, 1 }
  0x3b   : > { %v2601_v10 = vsel %vm235_vm1, %v510_v42, %v2451_v60  ;;  %v2618_v18 = vsel %vm324_vm4, %v2531_v27, %v1272_v9 }
  0x3c   : > { %632 = vrot.lane.b32.xlu1 %v2487_v12, %s2223_s6  ;;  %546 = vrot.lane.b32.xlu0 %v509_v16, %s2222_s5  ;;  %v2575_v16 = vsel %vm235_vm1, %v2438_v49, %v1174_v57  ;;  %v264_v57 = vrot.slane %v204_v59, 1  ;;  %v2614_v36 = vsel %vm235_vm1, %v2524_v29, %v1184_v58  ;;  %3261 = vst [vmem:[#allocation11_spill] sm:$0xff] %v2618_v18  ;;  %v207_v58 = vld [vmem:[%s2332_s28 + $0xa0] sm:$0x3] }
  0x3d   : > { %v269_v9 = vrot.slane %v207_v58, 1 }
  0x40   : > { %634 = vrot.lane.b32.xlu1 %v597_v41, %s2223_s6  ;;  %371 = vrot.lane.b32.xlu0 %v334_v52, %s2223_s6  ;;  %v353_v41 = vrot.slane %v204_v59, 2  ;;  %v2610_v52 = vsel %vm235_vm1, %v2438_v49, %v264_v57  ;;  %v250_v59 = vsel %vm235_vm1, %v2411_v37, %v249_v33  ;;  %v513_v57 = vrot.slane %v1755_v11, 1 }
  0x41   : > { %v601_v33 = vrot.slane %v1755_v11, 2  ;;  %v515_v11 = vrot.slane %v2647_v63, 1 }
  0x42   : > { %v2622_v42 = vsel %vm324_vm4, %v2445_v53, %v353_v41  ;;  %v2637_v41 = vsel %vm235_vm1, %v2482_v4, %v269_v9  ;;  %v514_v37 = vsel %vm235_vm1, %v2451_v60, %v513_v57  ;;  %v198_v57 = vld [vmem:[%s2332_s28 + $0x58] sm:$0x3]  ;;  %v1277_v9 = vrot.slane %v1829_v39, 2  ;;  %v1758_v39 = vld [vmem:[%s2332_s28 + $0x70] sm:$0x3] }
  0x43   : > { %3262 = vst [vmem:[#allocation12_spill] sm:$0xff] %v2622_v42  ;;  %3263 = vst [vmem:[#allocation13_spill] sm:$0xff] %v2637_v41  ;;  %v602_v56 = vsel %vm324_vm4, %v2461_v62, %v601_v33  ;;  %v358_v41 = vrot.slane %v207_v58, 2  ;;  %v2674_v44 = vsel %vm235_vm1, %v515_v11, %v2499_v21  ;;  %v254_v51 = vrot.slane %v198_v57, 1  ;;  %v2686_v11 = vld [vmem:[%s2332_s28 + $0xe0] sm:$0xff] }
  0x44   : > { %548 = vrot.lane.b32.xlu1 %v2601_v10, %s2222_s5  ;;  %284 = vrot.lane.b32.xlu0 %v2434_v47, %s2222_s5  ;;  %v518_v33 = vrot.slane %v1758_v39, 1  ;;  %v3250_v42 = vrot.slane %v2686_v11, 1 }
  0x45   : > { %v255_v58 = vsel %vm235_vm1, %v2451_v60, %v254_v51  ;;  %v606_v51 = vrot.slane %v1758_v39, 2 }
  0x46   : > { %v519_v60 = vsel %vm235_vm1, %v2499_v21, %v518_v33  ;;  %v1833_v33 = vld [vmem:[%s3233_s1 + $0x20] sm:$0xff] }
  0x47   : > { %v607_v21 = vsel %vm324_vm4, %v2517_v26, %v606_v51 }
  0x48   : > { %373 = vrot.lane.b32.xlu1 %v2487_v12, %s2223_s6  ;;  %286 = vrot.lane.b32.xlu0 %v250_v59, %s2222_s5  ;;  %v2654_v59 = vsel %vm235_vm1, %v2561_v25, %v1189_v46  ;;  %v2666_v46 = vsel %vm324_vm4, %v2565_v6, %v1277_v9 }
  0x49   : > { %3265 = vst [vmem:[#allocation15_spill] sm:$0xff] %v2654_v59  ;;  %3266 = vst [vmem:[#allocation16_spill] sm:$0xff] %v2666_v46  ;;  %v343_v46 = vrot.slane %v198_v57, 2  ;;  %v2703_v59 = vld [vmem:[%s2332_s28 + $0x78] sm:$0xff] }
  0x4a   : > { %v520_v39 = vrot.slane %v2703_v59, 1 }
  0x4b   : > { %v344_v57 = vsel %vm324_vm4, %v2461_v62, %v343_v46 }
  0x4c   : > { %636 = vrot.lane.b32.xlu1 %v2641_v3, %s2223_s6  ;;  %550 = vrot.lane.b32.xlu0 %v514_v37, %s2222_s5  ;;  %v2670_v37 = vsel %vm324_vm4, %v2492_v17, %v358_v41  ;;  %v603_v41 = vrot.slane %v2647_v63, 2  ;;  %v1832_v63 = vld [vmem:[%s2332_s28 + $0xe8] sm:$0x3]  ;;  %v2741_v46 = vsel %vm235_vm1, %v520_v39, %v2438_v49  ;;  %v2760_v49 = vld [vmem:[%s2332_s28 + $0x90] sm:$0xff] }
  0x4d   : > { %3267 = vst [vmem:[#allocation17_spill] sm:$0xff] %v2670_v37  ;;  %v1194_v18 = vrot.slane %v1832_v63, 1 }
  0x4e   : > { %v2697_v37 = vsel %vm324_vm4, %v603_v41, %v2517_v26  ;;  %v1280_v41 = vrot.slane %v2686_v11, 2 }
  0x50   : > { %638 = vrot.lane.b32.xlu1 %v602_v56, %s2223_s6  ;;  %375 = vrot.lane.b32.xlu0 %v339_v19, %s2223_s6  ;;  %v210_v56 = vld [vmem:[%s2332_s28 + $0xb8] sm:$0x3] }
  0x51   : > { %v274_v19 = vrot.slane %v210_v56, 1 }
  0x53   : > { %v2693_v9 = vsel %vm235_vm1, %v2524_v29, %v274_v19  ;;  %v1834_v19 = vld [vmem:[%s3233_s1 + $0x28] sm:$0xf] }
  0x54   : > { %552 = vrot.lane.b32.xlu1 %v2674_v44, %s2222_s5  ;;  %288 = vrot.lane.b32.xlu0 %v2601_v10, %s2222_s5 }
  0x58   : > { %377 = vrot.lane.b32.xlu1 %v2641_v3, %s2223_s6  ;;  %290 = vrot.lane.b32.xlu0 %v255_v58, %s2222_s5  ;;  %v2712_v58 = vsel %vm235_vm1, %v3250_v42, %v1194_v18  ;;  %v1282_v18 = vrot.slane %v1832_v63, 2  ;;  %v2726_v42 = vpack.c.bf16 %v1834_v19, %v1833_v33  ;;  %v608_v63 = vrot.slane %v2703_v59, 2 }
  0x5a   : > { %v2733_v62 = vsel %vm324_vm4, %v1280_v41, %v1282_v18  ;;  %2011 = vmatprep.subr.msk.bf16.mxu0 %vm2356_vm3, %v2726_v42 }
  0x5c   : > { %640 = vrot.lane.b32.xlu1 %v2697_v37, %s2223_s6  ;;  %554 = vrot.lane.b32.xlu0 %v519_v60, %s2222_s5  ;;  %v363_v60 = vrot.slane %v210_v56, 2  ;;  %v2753_v56 = vsel %vm324_vm4, %v608_v63, %v2445_v53 }
  0x5e   : > { %v2737_v26 = vsel %vm324_vm4, %v2531_v27, %v363_v60 }
  0x60   : > { %642 = vrot.lane.b32.xlu1 %v607_v21, %s2223_s6  ;;  %379 = vrot.lane.b32.xlu0 %v344_v57, %s2223_s6 }
  0x64   : > { %1196 = vrot.lane.b32.xlu1 %v2434_v47, %s2222_s5  ;;  %556 = vrot.lane.b32.xlu0 %v2741_v46, %s2222_s5  ;;  %v525_v47 = vrot.slane %v2760_v49, 1 }
  0x66   : > { %v2773_v53 = vsel %vm235_vm1, %v525_v47, %v2482_v4 }
  0x68   : > { %644 = vrot.lane.b32.xlu1 %v2753_v56, %s2223_s6  ;;  %558 = vrot.lane.b32.xlu0 %v2455_v61, %s2222_s5  ;;  %v613_v61 = vrot.slane %v2760_v49, 2 }
  0x6c   : > { %1284 = vrot.lane.b32.xlu1 %v2487_v12, %s2223_s6  ;;  %1198 = vrot.lane.b32.xlu0 %v2468_v0, %s2222_s5  ;;  %v2782_v0 = vsel %vm324_vm4, %v613_v61, %v2492_v17  ;;  %v2818_v17 = vld [vmem:[%s2332_s28 + $0xc0] sm:$0xff] }
  0x70   : > { %1286 = vrot.lane.b32.xlu1 %v2472_v1, %s2223_s6  ;;  %646 = vrot.lane.b32.xlu0 %v2476_v2, %s2223_s6  ;;  %v2789_v1 = vld [vmem:[%s2332_s28 + $0xa8] sm:$0xff] }
  0x71   : > { %v530_v2 = vrot.slane %v2789_v1, 1  ;;  %v618_v12 = vrot.slane %v2789_v1, 2 }
  0x73   : > { %v2802_v4 = vsel %vm235_vm1, %v530_v2, %v2524_v29 }
  0x74   : > { %1200 = vrot.lane.b32.xlu1 %v2601_v10, %s2222_s5  ;;  %560 = vrot.lane.b32.xlu0 %v2773_v53, %s2222_s5 }
  0x78   : > { %648 = vrot.lane.b32.xlu1 %v2782_v0, %s2223_s6  ;;  %562 = vrot.lane.b32.xlu0 %v2503_v22, %s2222_s5  ;;  %v535_v22 = vrot.slane %v2818_v17, 1 }
  0x7c   : > { %1288 = vrot.lane.b32.xlu1 %v2641_v3, %s2223_s6  ;;  %1202 = vrot.lane.b32.xlu0 %v2507_v23, %s2222_s5  ;;  %v2811_v3 = vsel %vm324_vm4, %v618_v12, %v2531_v27  ;;  %v2831_v23 = vsel %vm235_vm1, %v535_v22, %v2561_v25  ;;  %v3268_v22 = vld [vmem:[#allocation11_spill] sm:$0xff] }
  0x80   : > { %1290 = vrot.lane.b32.xlu1 %v2511_v24, %s2223_s6  ;;  %650 = vrot.lane.b32.xlu0 %v2521_v28, %s2223_s6  ;;  %v623_v24 = vrot.slane %v2818_v17, 2 }
  0x82   : > { %v2840_v28 = vsel %vm324_vm4, %v623_v24, %v2565_v6  ;;  %v3269_v24 = vld [vmem:[#allocation12_spill] sm:$0xff] }
  0x84   : > { %1204 = vrot.lane.b32.xlu1 %v2674_v44, %s2222_s5  ;;  %564 = vrot.lane.b32.xlu0 %v2802_v4, %s2222_s5 }
  0x88   : > { %652 = vrot.lane.b32.xlu1 %v2811_v3, %s2223_s6  ;;  %566 = vrot.lane.b32.xlu0 %v2539_v43, %s2222_s5 }
  0x8c   : > { %1292 = vrot.lane.b32.xlu1 %v2697_v37, %s2223_s6  ;;  %1206 = vrot.lane.b32.xlu0 %v2547_v54, %s2222_s5 }
  0x90   : > { %1294 = vrot.lane.b32.xlu1 %v2551_v48, %s2223_s6  ;;  %654 = vrot.lane.b32.xlu0 %v2555_v55, %s2223_s6 }
  0x94   : > { %1208 = vrot.lane.b32.xlu1 %v2741_v46, %s2222_s5  ;;  %568 = vrot.lane.b32.xlu0 %v2831_v23, %s2222_s5 }
  0x96   : > { %v279_v29 = vpop.permute.xlu1 %278  ;;  %v277_v27 = vpop.permute.xlu0 %276 }
  0x97   : > { %v414_v43 = vsel %vm413_vm5, %v2342_v7, %v277_v27 }
  0x98   : > { %656 = vrot.lane.b32.xlu1 %v2840_v28, %s2223_s6  ;;  %570 = vrot.lane.b32.xlu0 %v2571_v30, %s2222_s5 }
  0x9a   : > { %v366_v54 = vpop.permute.xlu1 %365  ;;  %v541_v48 = vpop.permute.xlu0 %540 }
  0x9b   : > { %v431_v55 = vsel %vm430_vm6, %v414_v43, %v366_v54  ;;  %v676_v25 = vsel %vm413_vm5, %v2350_v13, %v541_v48 }
  0x9c   : > { %1296 = vrot.lane.b32.xlu1 %v2753_v56, %s2223_s6  ;;  %1210 = vrot.lane.b32.xlu0 %v2575_v16, %s2222_s5  ;;  %v415_v16 = vsel %vm413_vm5, %v2338_v5, %v279_v29  ;;  %v3270_v29 = vld [vmem:[#allocation6_spill] sm:$0xff] }
  0x9d   : > { %1945 = vmatprep.mubr.msk.f32.mxu0 %vm711_vm7, %v431_v55 }
  0x9e   : > { %v629_v6 = vpop.permute.xlu1 %628  ;;  %v543_v30 = vpop.permute.xlu0 %542 }
  0x9f   : > { %v692_v7 = vsel %vm430_vm6, %v676_v25, %v629_v6  ;;  %v677_v10 = vsel %vm413_vm5, %v2353_v14, %v543_v30  ;;  %v3271_v30 = vld [vmem:[#allocation13_spill] sm:$0xff] }
  0xa0   : > { %1298 = vrot.lane.b32.xlu1 %v2579_v35, %s2223_s6  ;;  %658 = vrot.lane.b32.xlu0 %v2583_v34, %s2223_s6 }
  0xa1   : > { %1917 = vmatprep.mubr.msk.f32.mxu1 %vm711_vm7, %v692_v7 }
  0xa2   : > { %v631_v51 = vpop.permute.xlu1 %630  ;;  %v368_v21 = vpop.permute.xlu0 %367 }
  0xa3   : > { %v693_v57 = vsel %vm430_vm6, %v677_v10, %v631_v51  ;;  %v432_v39 = vsel %vm430_vm6, %v415_v16, %v368_v21  ;;  %v2951_v10 = vld [vmem:[%s2332_s28 + $0xd8] sm:$0xff]  ;;  %v3272_v51 = vld [vmem:[#allocation15_spill] sm:$0xff]  ;;  %v3273_v21 = vld [vmem:[#allocation14_spill] sm:$0xff]  ;;  %s1854_s28 = sshll.u32 %s2203_s15, 4 }
  0xa4   : > { %1212 = vrot.lane.b32.xlu1 %v2773_v53, %s2222_s5  ;;  %292 = vrot.lane.b32.xlu0 %v2674_v44, %s2222_s5  ;;  %s1647_s4 = sadd.s32 %s1855_s29, %s1854_s28 }
  0xa5   : > { %1918 = vmatmul.mubr.msk.f32.vlgmr.msra.gmra.mrb[0].mxu1 %vm711_vm7, %v693_v57  ;;  %1946 = vmatmul.mubr.msk.f32.vlgmr.msra.gmra.mrb[0].mxu0 %vm711_vm7, %v432_v39 }
  0xa6   : > { %v545_v5 = vpop.permute.xlu1 %544  ;;  %v281_v35 = vpop.permute.xlu0 %280  ;;  %2014 = vmatpush3.bf16.msk.msra.mxu0 %vm2356_vm3, %v2726_v42  ;;  %2016 = vmatpush3.bf16.msk.msra.mxu1 %vm2356_vm3, %v2344_v8 }
  0xa7   : > { %v416_v34 = vsel %vm413_vm5, %v2350_v13, %v281_v35  ;;  %v678_v8 = vsel %vm413_vm5, %v2395_v31, %v545_v5 }
  0xa8   : > { %381 = vrot.lane.b32.xlu1 %v2697_v37, %s2223_s6  ;;  %294 = vrot.lane.b32.xlu0 %v2587_v38, %s2222_s5 }
  0xaa   : > { %v370_v44 = vpop.permute.xlu1 %369  ;;  %v283_v33 = vpop.permute.xlu0 %282 }
  0xab   : > { %v433_v19 = vsel %vm430_vm6, %v416_v34, %v370_v44  ;;  %v417_v13 = vsel %vm413_vm5, %v2353_v14, %v283_v33  ;;  %v3274_v34 = vld [vmem:[#allocation16_spill] sm:$0xff]  ;;  %v3275_v44 = vld [vmem:[#allocation17_spill] sm:$0xff] }
  0xac   : > { %1300 = vrot.lane.b32.xlu1 %v2782_v0, %s2223_s6  ;;  %1214 = vrot.lane.b32.xlu0 %v2591_v40, %s2222_s5 }
  0xad   : > { %1948 = vmatprep.mubr.msk.f32.mxu0 %vm711_vm7, %v433_v19 }
  0xae   : > { %v633_v15 = vpop.permute.xlu1 %632  ;;  %v547_v38 = vpop.permute.xlu0 %546 }
  0xaf   : > { %v694_v42 = vsel %vm430_vm6, %v678_v8, %v633_v15  ;;  %v679_v40 = vsel %vm413_vm5, %v2398_v32, %v547_v38  ;;  %v3277_v8 = vld [vmem:[#allocation8_spill] sm:$0xff] }
  0xb0   : > { %1302 = vrot.lane.b32.xlu1 %v2597_v50, %s2223_s6  ;;  %383 = vrot.lane.b32.xlu0 %v2605_v45, %s2223_s6 }
  0xb1   : > { %1920 = vmatprep.mubr.msk.f32.mxu1 %vm711_vm7, %v694_v42 }
  0xb2   : > { %v635_v37 = vpop.permute.xlu1 %634  ;;  %v372_v18 = vpop.permute.xlu0 %371 }
  0xb3   : > { %v695_v60 = vsel %vm430_vm6, %v679_v40, %v635_v37  ;;  %v434_v63 = vsel %vm430_vm6, %v417_v13, %v372_v18  ;;  %v1279_v37 = vrot.slane %v2951_v10, 2 }
  0xb4   : > { %1216 = vrot.lane.b32.xlu1 %v2802_v4, %s2222_s5  ;;  %296 = vrot.lane.b32.xlu0 %v2741_v46, %s2222_s5 }
  0xb5   : > { %1921 = vmatmul.mubr.msk.f32.gmra.mrb[2].mxu1 %vm711_vm7, %v695_v60  ;;  %1949 = vmatmul.mubr.msk.f32.gmra.mrb[2].mxu0 %vm711_vm7, %v434_v63  ;;  %v1281_v63 = vsel %vm324_vm4, %v1279_v37, %v1280_v41 }
  0xb6   : > { %v549_v14 = vpop.permute.xlu1 %548  ;;  %v285_v50 = vpop.permute.xlu0 %284 }
  0xb7   : > { %v418_v45 = vsel %vm413_vm5, %v2395_v31, %v285_v50  ;;  %v680_v46 = vsel %vm413_vm5, %v2496_v20, %v549_v14 }
  0xb8   : > { %385 = vrot.lane.b32.xlu1 %v2753_v56, %s2223_s6  ;;  %298 = vrot.lane.b32.xlu0 %v2610_v52, %s2222_s5 }
  0xba   : > { %v374_v47 = vpop.permute.xlu1 %373  ;;  %v287_v61 = vpop.permute.xlu0 %286 }
  0xbb   : > { %v435_v2 = vsel %vm430_vm6, %v418_v45, %v374_v47 }
  0xbc   : > { %1304 = vrot.lane.b32.xlu1 %v2811_v3, %s2223_s6  ;;  %1218 = vrot.lane.b32.xlu0 %v2614_v36, %s2222_s5  ;;  %v419_v36 = vsel %vm413_vm5, %v2398_v32, %v287_v61  ;;  %v3278_v61 = vld [vmem:[#allocation5_spill] sm:$0xff] }
  0xbd   : > { %1951 = vmatprep.mubr.msk.f32.mxu0 %vm711_vm7, %v435_v2 }
  0xbe   : > { %v637_v56 = vpop.permute.xlu1 %636  ;;  %v551_v52 = vpop.permute.xlu0 %550 }
  0xbf   : > { %v696_v12 = vsel %vm430_vm6, %v680_v46, %v637_v56  ;;  %v681_v27 = vsel %vm413_vm5, %v3270_v29, %v551_v52 }
  0xc0   : > { %1306 = vrot.lane.b32.xlu1 %v3268_v22, %s2223_s6  ;;  %387 = vrot.lane.b32.xlu0 %v3269_v24, %s2223_s6 }
  0xc1   : > { %1923 = vmatprep.mubr.msk.f32.mxu1 %vm711_vm7, %v696_v12 }
  0xc2   : > { %v639_v43 = vpop.permute.xlu1 %638  ;;  %v376_v54 = vpop.permute.xlu0 %375 }
  0xc3   : > { %v697_v48 = vsel %vm430_vm6, %v681_v27, %v639_v43  ;;  %v436_v55 = vsel %vm430_vm6, %v419_v36, %v376_v54 }
  0xc4   : > { %1220 = vrot.lane.b32.xlu1 %v2831_v23, %s2222_s5  ;;  %300 = vrot.lane.b32.xlu0 %v2773_v53, %s2222_s5 }
  0xc5   : > { %1924 = vmatmul.mubr.msk.f32.gmra.mrb[4].mxu1 %vm711_vm7, %v697_v48  ;;  %1952 = vmatmul.mubr.msk.f32.gmra.mrb[4].mxu0 %vm711_vm7, %v436_v55  ;;  %v3279_v48 = vld [vmem:[#allocation7_spill] sm:$0xff] }
  0xc6   : > { %v553_v25 = vpop.permute.xlu1 %552  ;;  %v289_v6 = vpop.permute.xlu0 %288 }
  0xc7   : > { %v420_v7 = vsel %vm413_vm5, %v2496_v20, %v289_v6  ;;  %v682_v57 = vsel %vm413_vm5, %v3273_v21, %v553_v25 }
  0xc8   : > { %389 = vrot.lane.b32.xlu1 %v2782_v0, %s2223_s6  ;;  %302 = vrot.lane.b32.xlu0 %v3271_v30, %s2222_s5  ;;  %v1191_v0 = vrot.slane %v2951_v10, 1 }
  0xca   : > { %v378_v16 = vpop.permute.xlu1 %377  ;;  %v291_v23 = vpop.permute.xlu0 %290 }
  0xcb   : > { %v437_v53 = vsel %vm430_vm6, %v420_v7, %v378_v16  ;;  %v421_v19 = vsel %vm413_vm5, %v3270_v29, %v291_v23 }
  0xcc   : > { %1308 = vrot.lane.b32.xlu1 %v2840_v28, %s2223_s6  ;;  %1222 = vrot.lane.b32.xlu0 %v3272_v51, %s2222_s5  ;;  %v3276_v28 = vrot.slane %v2686_v11, 1 }
  0xcd   : > { %1954 = vmatprep.mubr.msk.f32.mxu0 %vm711_vm7, %v437_v53 }
  0xce   : > { %v641_v39 = vpop.permute.xlu1 %640  ;;  %v555_v5 = vpop.permute.xlu0 %554  ;;  %v1193_v33 = vsel %vm235_vm1, %v1191_v0, %v3276_v28 }
  0xcf   : > { %v698_v35 = vsel %vm430_vm6, %v682_v57, %v641_v39  ;;  %v683_v15 = vsel %vm413_vm5, %v3277_v8, %v555_v5 }
  0xd0   : > { %1310 = vrot.lane.b32.xlu1 %v3274_v34, %s2223_s6  ;;  %391 = vrot.lane.b32.xlu0 %v3275_v44, %s2223_s6  ;;  %v3280_v34 = vld [vmem:[#allocation9_spill] sm:$0xff] }
  0xd1   : > { %1926 = vmatprep.mubr.msk.f32.mxu1 %vm711_vm7, %v698_v35 }
  0xd2   : > { %v643_v38 = vpop.permute.xlu1 %642  ;;  %v380_v42 = vpop.permute.xlu0 %379 }
  0xd3   : > { %v699_v13 = vsel %vm430_vm6, %v683_v15, %v643_v38  ;;  %v438_v40 = vsel %vm430_vm6, %v421_v19, %v380_v42 }
  0xd4   : > { %1224 = vrot.lane.b32.xlu1 %v1193_v33, %s2222_s5  ;;  %304 = vrot.lane.b32.xlu0 %v2802_v4, %s2222_s5 }
  0xd5   : > { %1927 = vmatmul.mubr.msk.f32.gmra.mrb[6].mxu1 %vm711_vm7, %v699_v13  ;;  %1955 = vmatmul.mubr.msk.f32.gmra.mrb[6].mxu0 %vm711_vm7, %v438_v40 }
  0xd6   : > { %v1197_v18 = vpop.permute.xlu1 %1196  ;;  %v557_v60 = vpop.permute.xlu0 %556 }
  0xd7   : > { %v684_v4 = vsel %vm413_vm5, %v2703_v59, %v557_v60 }
  0xd8   : > { %393 = vrot.lane.b32.xlu1 %v2811_v3, %s2223_s6  ;;  %306 = vrot.lane.b32.xlu0 %v2693_v9, %s2222_s5  ;;  %v1332_v9 = vsel %vm413_vm5, %v2395_v31, %v1197_v18 }
  0xda   : > { %v645_v14 = vpop.permute.xlu1 %644  ;;  %v559_v50 = vpop.permute.xlu0 %558 }
  0xdb   : > { %v700_v45 = vsel %vm430_vm6, %v684_v4, %v645_v14 }
  0xdc   : > { %1312 = vrot.lane.b32.xlu1 %v1281_v63, %s2223_s6  ;;  %1226 = vrot.lane.b32.xlu0 %v2712_v58, %s2222_s5  ;;  %v685_v58 = vsel %vm413_vm5, %v3278_v61, %v559_v50  ;;  %s1856_s5 = sshll.u32 %s1647_s4, 7 }
  0xdd   : > { %1929 = vmatprep.mubr.msk.f32.mxu1 %vm711_vm7, %v700_v45  ;;  %v3281_v45 = vld [vmem:[#allocation10_spill] sm:$0xff]  ;;  %s3171_s8 = scalar_lea.hbm %s3235_s3, %s1856_s5 }
  0xde   : > { %v1285_v3 = vpop.permute.xlu1 %1284  ;;  %v1199_v47 = vpop.permute.xlu0 %1198 }
  0xdf   : > { %v1348_v41 = vsel %vm430_vm6, %v1332_v9, %v1285_v3  ;;  %v1333_v2 = vsel %vm413_vm5, %v2398_v32, %v1199_v47 }
  0xe0   : > { %1314 = vrot.lane.b32.xlu1 %v2733_v62, %s2223_s6  ;;  %395 = vrot.lane.b32.xlu0 %v2737_v26, %s2223_s6 }
  0xe1   : > { %1973 = vmatprep.mubr.msk.f32.mxu0 %vm711_vm7, %v1348_v41 }
  0xe2   : > { %v1287_v46 = vpop.permute.xlu1 %1286  ;;  %v647_v31 = vpop.permute.xlu0 %646 }
  0xe3   : > { %v1349_v56 = vsel %vm430_vm6, %v1333_v2, %v1287_v46  ;;  %v701_v52 = vsel %vm430_vm6, %v685_v58, %v647_v31 }
  0xe4   : > { %1930 = vmatmul.mubr.msk.f32.gmra.mrb[8].mxu1 %vm711_vm7, %v701_v52  ;;  %1974 = vmatmul.mubr.msk.f32.vlgmr.msra.gmra.mrb[0].mxu0 %vm711_vm7, %v1349_v56 }
  0xe6   : > { %v1201_v62 = vpop.permute.xlu1 %1200  ;;  %v561_v26 = vpop.permute.xlu0 %560 }
  0xe7   : > { %v686_v12 = vsel %vm413_vm5, %v2760_v49, %v561_v26  ;;  %v1334_v32 = vsel %vm413_vm5, %v2496_v20, %v1201_v62 }
  0xea   : > { %v649_v22 = vpop.permute.xlu1 %648  ;;  %v563_v24 = vpop.permute.xlu0 %562 }
  0xeb   : > { %v702_v36 = vsel %vm430_vm6, %v686_v12, %v649_v22  ;;  %v687_v55 = vsel %vm413_vm5, %v3279_v48, %v563_v24 }
  0xec   : > { %1932 = vmatprep.mubr.msk.f32.mxu1 %vm711_vm7, %v702_v36 }
  0xee   : > { %v1289_v27 = vpop.permute.xlu1 %1288  ;;  %v1203_v43 = vpop.permute.xlu0 %1202 }
  0xef   : > { %v1350_v54 = vsel %vm430_vm6, %v1334_v32, %v1289_v27  ;;  %v1335_v25 = vsel %vm413_vm5, %v3270_v29, %v1203_v43 }
  0xf0   : > { %1976 = vmatprep.mubr.msk.f32.mxu0 %vm711_vm7, %v1350_v54 }
  0xf2   : > { %v1291_v6 = vpop.permute.xlu1 %1290  ;;  %v651_v30 = vpop.permute.xlu0 %650 }
  0xf3   : > { %v1351_v7 = vsel %vm430_vm6, %v1335_v25, %v1291_v6  ;;  %v703_v16 = vsel %vm430_vm6, %v687_v55, %v651_v30 }
  0xf4   : > { %1933 = vmatmul.mubr.msk.f32.gmra.mrb[10].mxu1 %vm711_vm7, %v703_v16  ;;  %1977 = vmatmul.mubr.msk.f32.gmra.mrb[2].mxu0 %vm711_vm7, %v1351_v7 }
  0xf6   : > { %v1205_v20 = vpop.permute.xlu1 %1204  ;;  %v565_v23 = vpop.permute.xlu0 %564 }
  0xf7   : > { %v688_v53 = vsel %vm413_vm5, %v2789_v1, %v565_v23  ;;  %v1336_v29 = vsel %vm413_vm5, %v3273_v21, %v1205_v20 }
  0xfa   : > { %v653_v51 = vpop.permute.xlu1 %652  ;;  %v567_v0 = vpop.permute.xlu0 %566 }
  0xfb   : > { %v704_v57 = vsel %vm430_vm6, %v688_v53, %v653_v51  ;;  %v689_v44 = vsel %vm413_vm5, %v3280_v34, %v567_v0 }
  0xfc   : > { %1935 = vmatprep.mubr.msk.f32.mxu1 %vm711_vm7, %v704_v57 }
  0xfe   : > { %v1293_v39 = vpop.permute.xlu1 %1292  ;;  %v1207_v5 = vpop.permute.xlu0 %1206 }
  0xff   : > { %v1352_v35 = vsel %vm430_vm6, %v1336_v29, %v1293_v39  ;;  %v1337_v28 = vsel %vm413_vm5, %v3277_v8, %v1207_v5 }
 0x100   : > { %1979 = vmatprep.mubr.msk.f32.mxu0 %vm711_vm7, %v1352_v35 }
 0x102   : > { %v1295_v33 = vpop.permute.xlu1 %1294  ;;  %v655_v19 = vpop.permute.xlu0 %654 }
 0x103   : > { %v1353_v15 = vsel %vm430_vm6, %v1337_v28, %v1295_v33  ;;  %v705_v38 = vsel %vm430_vm6, %v689_v44, %v655_v19 }
 0x104   : > { %1936 = vmatmul.mubr.msk.f32.gmra.mrb[12].mxu1 %vm711_vm7, %v705_v38  ;;  %1980 = vmatmul.mubr.msk.f32.gmra.mrb[4].mxu0 %vm711_vm7, %v1353_v15 }
 0x106   : > { %v1209_v42 = vpop.permute.xlu1 %1208  ;;  %v569_v13 = vpop.permute.xlu0 %568 }
 0x107   : > { %v690_v40 = vsel %vm413_vm5, %v2818_v17, %v569_v13  ;;  %v1338_v63 = vsel %vm413_vm5, %v2703_v59, %v1209_v42 }
 0x10a   : > { %v657_v37 = vpop.permute.xlu1 %656  ;;  %v571_v18 = vpop.permute.xlu0 %570 }
 0x10b   : > { %v706_v60 = vsel %vm430_vm6, %v690_v40, %v657_v37  ;;  %v691_v9 = vsel %vm413_vm5, %v3281_v45, %v571_v18 }
 0x10c   : > { %1938 = vmatprep.mubr.msk.f32.mxu1 %vm711_vm7, %v706_v60 }
 0x10e   : > { %v1297_v4 = vpop.permute.xlu1 %1296  ;;  %v1211_v14 = vpop.permute.xlu0 %1210 }
 0x10f   : > { %v1354_v50 = vsel %vm430_vm6, %v1338_v63, %v1297_v4  ;;  %v1339_v3 = vsel %vm413_vm5, %v3278_v61, %v1211_v14 }
 0x110   : > { %1982 = vmatprep.mubr.msk.f32.mxu0 %vm711_vm7, %v1354_v50 }
 0x112   : > { %v1299_v47 = vpop.permute.xlu1 %1298  ;;  %v659_v41 = vpop.permute.xlu0 %658 }
 0x113   : > { %v1355_v58 = vsel %vm430_vm6, %v1339_v3, %v1299_v47  ;;  %v707_v2 = vsel %vm430_vm6, %v691_v9, %v659_v41 }
 0x114   : > { %1939 = vmatmul.mubr.msk.f32.gmra.mrb[14].mxu1 %vm711_vm7, %v707_v2  ;;  %1983 = vmatmul.mubr.msk.f32.gmra.mrb[6].mxu0 %vm711_vm7, %v1355_v58 }
 0x116   : > { %v1213_v46 = vpop.permute.xlu1 %1212  ;;  %v293_v31 = vpop.permute.xlu0 %292 }
 0x117   : > { %v422_v56 = vsel %vm413_vm5, %v3273_v21, %v293_v31  ;;  %v1340_v12 = vsel %vm413_vm5, %v2760_v49, %v1213_v46 }
 0x11a   : > { %v382_v52 = vpop.permute.xlu1 %381  ;;  %v295_v62 = vpop.permute.xlu0 %294 }
 0x11b   : > { %v439_v26 = vsel %vm430_vm6, %v422_v56, %v382_v52  ;;  %v423_v32 = vsel %vm413_vm5, %v3277_v8, %v295_v62 }
 0x11c   : > { %1957 = vmatprep.mubr.msk.f32.mxu1 %vm711_vm7, %v439_v26 }
 0x11e   : > { %v1301_v22 = vpop.permute.xlu1 %1300  ;;  %v1215_v24 = vpop.permute.xlu0 %1214 }
 0x11f   : > { %v1356_v36 = vsel %vm430_vm6, %v1340_v12, %v1301_v22  ;;  %v1341_v21 = vsel %vm413_vm5, %v3279_v48, %v1215_v24 }
 0x120   : > { %1985 = vmatprep.mubr.msk.f32.mxu0 %vm711_vm7, %v1356_v36  ;;  %v3129_v36 = vld [vmem:[%s3234_s2] ss:$0 sm:$0xff] }
 0x122   : > { %v1303_v27 = vpop.permute.xlu1 %1302  ;;  %v384_v43 = vpop.permute.xlu0 %383 }
 0x123   : > { %v1357_v54 = vsel %vm430_vm6, %v1341_v21, %v1303_v27  ;;  %v440_v55 = vsel %vm430_vm6, %v423_v32, %v384_v43 }
 0x124   : > { %1958 = vmatmul.mubr.msk.f32.vlgmr.msra.gmra.mrb[8].mxu1 %vm711_vm7, %v440_v55  ;;  %1986 = vmatmul.mubr.msk.f32.gmra.mrb[8].mxu0 %vm711_vm7, %v1357_v54 }
 0x126   : > { %v1217_v25 = vpop.permute.xlu1 %1216  ;;  %v297_v6 = vpop.permute.xlu0 %296 }
 0x127   : > { %v424_v30 = vsel %vm413_vm5, %v2703_v59, %v297_v6  ;;  %v1342_v20 = vsel %vm413_vm5, %v2789_v1, %v1217_v25 }
 0x12a   : > { %v386_v7 = vpop.permute.xlu1 %385  ;;  %v299_v8 = vpop.permute.xlu0 %298 }
 0x12b   : > { %v441_v16 = vsel %vm430_vm6, %v424_v30, %v386_v7  ;;  %v425_v0 = vsel %vm413_vm5, %v3278_v61, %v299_v8 }
 0x12c   : > { %1960 = vmatprep.mubr.msk.f32.mxu1 %vm711_vm7, %v441_v16 }
 0x12e   : > { %v1305_v23 = vpop.permute.xlu1 %1304  ;;  %v1219_v53 = vpop.permute.xlu0 %1218 }
 0x12f   : > { %v1358_v51 = vsel %vm430_vm6, %v1342_v20, %v1305_v23  ;;  %v1343_v59 = vsel %vm413_vm5, %v3280_v34, %v1219_v53 }
 0x130   : > { %1988 = vmatprep.mubr.msk.f32.mxu0 %vm711_vm7, %v1358_v51 }
 0x132   : > { %v1307_v57 = vpop.permute.xlu1 %1306  ;;  %v388_v29 = vpop.permute.xlu0 %387 }
 0x133   : > { %v1359_v39 = vsel %vm430_vm6, %v1343_v59, %v1307_v57  ;;  %v442_v5 = vsel %vm430_vm6, %v425_v0, %v388_v29 }
 0x134   : > { %1961 = vmatmul.mubr.msk.f32.gmra.mrb[10].mxu1 %vm711_vm7, %v442_v5  ;;  %1989 = vmatmul.mubr.msk.f32.gmra.mrb[10].mxu0 %vm711_vm7, %v1359_v39 }
 0x136   : > { %v1221_v35 = vpop.permute.xlu1 %1220  ;;  %v301_v44 = vpop.permute.xlu0 %300 }
 0x137   : > { %v426_v28 = vsel %vm413_vm5, %v2760_v49, %v301_v44  ;;  %v1344_v15 = vsel %vm413_vm5, %v2818_v17, %v1221_v35 }
 0x13a   : > { %v390_v33 = vpop.permute.xlu1 %389  ;;  %v303_v61 = vpop.permute.xlu0 %302 }
 0x13b   : > { %v443_v19 = vsel %vm430_vm6, %v426_v28, %v390_v33  ;;  %v427_v40 = vsel %vm413_vm5, %v3279_v48, %v303_v61 }
 0x13c   : > { %1963 = vmatprep.mubr.msk.f32.mxu1 %vm711_vm7, %v443_v19 }
 0x13e   : > { %v1309_v38 = vpop.permute.xlu1 %1308  ;;  %v1223_v42 = vpop.permute.xlu0 %1222 }
 0x13f   : > { %v1360_v13 = vsel %vm430_vm6, %v1344_v15, %v1309_v38  ;;  %v1345_v49 = vsel %vm413_vm5, %v3281_v45, %v1223_v42 }
 0x140   : > { %1991 = vmatprep.mubr.msk.f32.mxu0 %vm711_vm7, %v1360_v13 }
 0x142   : > { %v1311_v37 = vpop.permute.xlu1 %1310  ;;  %v392_v18 = vpop.permute.xlu0 %391 }
 0x143   : > { %v1361_v60 = vsel %vm430_vm6, %v1345_v49, %v1311_v37  ;;  %v444_v63 = vsel %vm430_vm6, %v427_v40, %v392_v18 }
 0x144   : > { %1964 = vmatmul.mubr.msk.f32.gmra.mrb[12].mxu1 %vm711_vm7, %v444_v63  ;;  %1992 = vmatmul.mubr.msk.f32.gmra.mrb[12].mxu0 %vm711_vm7, %v1361_v60 }
 0x146   : > { %v1225_v17 = vpop.permute.xlu1 %1224  ;;  %v305_v4 = vpop.permute.xlu0 %304 }
 0x147   : > { %v428_v14 = vsel %vm413_vm5, %v2789_v1, %v305_v4  ;;  %v1346_v45 = vsel %vm413_vm5, %v2951_v10, %v1225_v17 }
 0x14a   : > { %v394_v50 = vpop.permute.xlu1 %393  ;;  %v307_v48 = vpop.permute.xlu0 %306 }
 0x14b   : > { %v445_v9 = vsel %vm430_vm6, %v428_v14, %v394_v50  ;;  %v429_v58 = vsel %vm413_vm5, %v3280_v34, %v307_v48 }
 0x14c   : > { %1966 = vmatprep.mubr.msk.f32.mxu1 %vm711_vm7, %v445_v9 }
 0x14e   : > { %v1313_v3 = vpop.permute.xlu1 %1312  ;;  %v1227_v47 = vpop.permute.xlu0 %1226 }
 0x14f   : > { %v1362_v41 = vsel %vm430_vm6, %v1346_v45, %v1313_v3  ;;  %v1347_v1 = vsel %vm413_vm5, %v2686_v11, %v1227_v47 }
 0x150   : > { %1994 = vmatprep.mubr.msk.f32.mxu0 %vm711_vm7, %v1362_v41 }
 0x152   : > { %v1315_v2 = vpop.permute.xlu1 %1314  ;;  %v396_v46 = vpop.permute.xlu0 %395 }
 0x153   : > { %v1363_v31 = vsel %vm430_vm6, %v1347_v1, %v1315_v2  ;;  %v446_v10 = vsel %vm430_vm6, %v429_v58, %v396_v46 }
 0x154   : > { %1967 = vmatmul.mubr.msk.f32.gmra.mrb[14].mxu1 %vm711_vm7, %v446_v10  ;;  %1995 = vmatmul.mubr.msk.f32.gmra.mrb[14].mxu0 %vm711_vm7, %v1363_v31 }
 0x178   : > { %v1919_v56 = vpop.f32.mrb[0].mxu1 }
 0x179   : > { %v830_v52 = vpop.f32.mrb[1].mxu1 }
 0x188   : > { %v1922_v62 = vpop.f32.mrb[2].mxu1 }
 0x189   : > { %v840_v26 = vpop.f32.mrb[3].mxu1 }
 0x198   : > { %v1925_v34 = vpop.f32.mrb[4].mxu1 }
 0x199   : > { %v850_v12 = vpop.f32.mrb[5].mxu1 }
 0x1a8   : > { %v1928_v22 = vpop.f32.mrb[6].mxu1 }
 0x1a9   : > { %v860_v24 = vpop.f32.mrb[7].mxu1 }
 0x1b7   : > { %v1975_v11 = vpop.f32.mrb[0].mxu0 }
 0x1b8   : > { %v2017_v32 = vadd.f32 %v1975_v11, %v1919_v56  ;;  %v1484_v21 = vpop.f32.mrb[1].mxu0 }
 0x1b9   : > { %v2018_v27 = vadd.f32 %v1484_v21, %v830_v52 }
 0x1ba   : > { %v1587_v43 = vadd.f32 %v2017_v32, %v3129_v36 }
 0x1bb   : > { %v1586_v54 = vadd.f32 %v2018_v27, %v3129_v36 }
 0x1bc   : > { %v1603_v55 = vmax.f32 %v1587_v43, 0.0 }
 0x1bd   : > { %v1602_v25 = vmax.f32 %v1586_v54, 0.0 }
 0x1be   : > { %1619 = vst [vmem:[%s3135_s27 + $0x8] sm:$0xff] %v1603_v55 }
 0x1bf   : > { %1618 = vst [vmem:[%s3135_s27] sm:$0xff] %v1602_v25 }
 0x1c7   : > { %v1978_v6 = vpop.f32.mrb[2].mxu0 }
 0x1c8   : > { %v2019_v30 = vadd.f32 %v1978_v6, %v1922_v62  ;;  %v1494_v7 = vpop.f32.mrb[3].mxu0 }
 0x1c9   : > { %v2020_v8 = vadd.f32 %v1494_v7, %v840_v26 }
 0x1ca   : > { %v1589_v16 = vadd.f32 %v2019_v30, %v3129_v36 }
 0x1cb   : > { %v1588_v20 = vadd.f32 %v2020_v8, %v3129_v36 }
 0x1cc   : > { %v1605_v23 = vmax.f32 %v1589_v16, 0.0 }
 0x1cd   : > { %v1604_v53 = vmax.f32 %v1588_v20, 0.0 }
 0x1ce   : > { %1621 = vst [vmem:[%s3135_s27 + $0x18] sm:$0xff] %v1605_v23 }
 0x1cf   : > { %1620 = vst [vmem:[%s3135_s27 + $0x10] sm:$0xff] %v1604_v53 }
 0x1d7   : > { %v1981_v51 = vpop.f32.mrb[4].mxu0 }
 0x1d8   : > { %v2021_v0 = vadd.f32 %v1981_v51, %v1925_v34  ;;  %v1504_v59 = vpop.f32.mrb[5].mxu0 }
 0x1d9   : > { %v2022_v57 = vadd.f32 %v1504_v59, %v850_v12 }
 0x1da   : > { %v1591_v29 = vadd.f32 %v2021_v0, %v3129_v36 }
 0x1db   : > { %v1590_v39 = vadd.f32 %v2022_v57, %v3129_v36 }
 0x1dc   : > { %v1607_v5 = vmax.f32 %v1591_v29, 0.0 }
 0x1dd   : > { %v1606_v35 = vmax.f32 %v1590_v39, 0.0 }
 0x1de   : > { %1623 = vst [vmem:[%s3135_s27 + $0x28] sm:$0xff] %v1607_v5 }
 0x1df   : > { %1622 = vst [vmem:[%s3135_s27 + $0x20] sm:$0xff] %v1606_v35 }
 0x1e7   : > { %v1984_v44 = vpop.f32.mrb[6].mxu0 }
 0x1e8   : > { %v2023_v28 = vadd.f32 %v1984_v44, %v1928_v22  ;;  %v1514_v33 = vpop.f32.mrb[7].mxu0 }
 0x1e9   : > { %v2024_v61 = vadd.f32 %v1514_v33, %v860_v24 }
 0x1ea   : > { %v1593_v19 = vadd.f32 %v2023_v28, %v3129_v36 }
 0x1eb   : > { %v1592_v15 = vadd.f32 %v2024_v61, %v3129_v36 }
 0x1ec   : > { %v1609_v38 = vmax.f32 %v1593_v19, 0.0 }
 0x1ed   : > { %v1608_v42 = vmax.f32 %v1592_v15, 0.0 }
 0x1ee   : > { %1625 = vst [vmem:[%s3135_s27 + $0x38] sm:$0xff] %v1609_v38 }
 0x1ef   : > { %1624 = vst [vmem:[%s3135_s27 + $0x30] sm:$0xff] %v1608_v42 }
 0x1f7   : > { %v1959_v13 = vpop.f32.mrb[8].mxu1  ;;  %v1987_v40 = vpop.f32.mrb[8].mxu0 }
 0x1f8   : > { %v2025_v49 = vadd.f32 %v1987_v40, %v1959_v13  ;;  %v1066_v37 = vpop.f32.mrb[9].mxu1  ;;  %v1524_v18 = vpop.f32.mrb[9].mxu0 }
 0x1f9   : > { %v2026_v60 = vadd.f32 %v1524_v18, %v1066_v37 }
 0x1fa   : > { %v1595_v63 = vadd.f32 %v2025_v49, %v3129_v36 }
 0x1fb   : > { %v1594_v17 = vadd.f32 %v2026_v60, %v3129_v36 }
 0x1fc   : > { %v1611_v4 = vmax.f32 %v1595_v63, 0.0 }
 0x1fd   : > { %v1610_v14 = vmax.f32 %v1594_v17, 0.0 }
 0x1fe   : > { %1627 = vst [vmem:[%s3135_s27 + $0x48] sm:$0xff] %v1611_v4 }
 0x1ff   : > { %1626 = vst [vmem:[%s3135_s27 + $0x40] sm:$0xff] %v1610_v14 }
 0x207   : > { %v1962_v50 = vpop.f32.mrb[10].mxu1  ;;  %v1990_v48 = vpop.f32.mrb[10].mxu0 }
 0x208   : > { %v2027_v9 = vadd.f32 %v1990_v48, %v1962_v50  ;;  %v1076_v45 = vpop.f32.mrb[11].mxu1  ;;  %v1534_v3 = vpop.f32.mrb[11].mxu0 }
 0x209   : > { %v2028_v47 = vadd.f32 %v1534_v3, %v1076_v45 }
 0x20a   : > { %v1597_v41 = vadd.f32 %v2027_v9, %v3129_v36 }
 0x20b   : > { %v1596_v58 = vadd.f32 %v2028_v47, %v3129_v36 }
 0x20c   : > { %v1613_v1 = vmax.f32 %v1597_v41, 0.0 }
 0x20d   : > { %v1612_v2 = vmax.f32 %v1596_v58, 0.0 }
 0x20e   : > { %1629 = vst [vmem:[%s3135_s27 + $0x58] sm:$0xff] %v1613_v1 }
 0x20f   : > { %1628 = vst [vmem:[%s3135_s27 + $0x50] sm:$0xff] %v1612_v2 }
 0x217   : > { %v1965_v46 = vpop.f32.mrb[12].mxu1  ;;  %v1993_v31 = vpop.f32.mrb[12].mxu0 }
 0x218   : > { %v2029_v10 = vadd.f32 %v1993_v31, %v1965_v46  ;;  %v1086_v56 = vpop.f32.mrb[13].mxu1  ;;  %v1544_v52 = vpop.f32.mrb[13].mxu0 }
 0x219   : > { %v2030_v62 = vadd.f32 %v1544_v52, %v1086_v56 }
 0x21a   : > { %v1599_v26 = vadd.f32 %v2029_v10, %v3129_v36 }
 0x21b   : > { %v1598_v34 = vadd.f32 %v2030_v62, %v3129_v36 }
 0x21c   : > { %v1615_v12 = vmax.f32 %v1599_v26, 0.0 }
 0x21d   : > { %v1614_v22 = vmax.f32 %v1598_v34, 0.0 }
 0x21e   : > { %1631 = vst [vmem:[%s3135_s27 + $0x68] sm:$0xff] %v1615_v12 }
 0x21f   : > { %1630 = vst [vmem:[%s3135_s27 + $0x60] sm:$0xff] %v1614_v22 }
 0x227   : > { %v1968_v24 = vpop.f32.mrb[14].mxu1  ;;  %v1996_v11 = vpop.f32.mrb[14].mxu0 }
 0x228   : > { %v2031_v32 = vadd.f32 %v1996_v11, %v1968_v24  ;;  %v1096_v21 = vpop.f32.mrb[15].mxu1  ;;  %v1554_v27 = vpop.f32.mrb[15].mxu0 }
 0x229   : > { %v2032_v43 = vadd.f32 %v1554_v27, %v1096_v21 }
 0x22a   : > { %v1601_v54 = vadd.f32 %v2031_v32, %v3129_v36 }
 0x22b   : > { %v1600_v55 = vadd.f32 %v2032_v43, %v3129_v36 }
 0x22c   : > { %v1617_v25 = vmax.f32 %v1601_v54, 0.0 }
 0x22d   : > { %v1616_v6 = vmax.f32 %v1600_v55, 0.0 }
 0x22e   : > { %1633 = vst [vmem:[%s3135_s27 + $0x78] sm:$0xff] %v1617_v25 }
 0x22f   : > { %1632 = vst [vmem:[%s3135_s27 + $0x70] sm:$0xff] %v1616_v6 }
 0x230   : > { %2138 = shalt.err (!%p2135_p6)
}
 0x231   : > { %s2139_s11 = scalar_lea.hbm %s3171_s8, 2048  ;;  %s2143_s29 = scalar_lea.hbm %s3235_s3, 8192 }
 0x232   : > { %p2140_p7 = scmp.ne.s32.totalorder %s3171_s8, %s2139_s11  ;;  %p2144_p11 = scmp.lt.u32.totalorder %s3171_s8, %s3235_s3 }
 0x233   : > { %p2145_p12 = scmp.lt.u32.totalorder %s2143_s29, %s2139_s11  ;;  %p2147_p0 = scmp.lt.u32.totalorder %s2139_s11, %s3171_s8 }
 0x234   : > { %p2141_p9 = pnand %p2140_p7, %p2297_p3 }
 0x235   : > { %p2146_p13 = por %p2145_p12, %p2144_p11 }
 0x236   : > { %p2142_p10 = pneg %p2141_p9 }
 0x237   : > { %p2148_p1 = por %p2147_p0, %p2146_p13 }
 0x239   : > { %p2149_p2 = pnand %p2148_p1, %p2142_p10 }
 0x23b   : > { %2152 = shalt.err (!%p2149_p2)
}
 0x23c   : > { %s2225_s15 = smov 128  }
 0x23d   : > { %2050 = dma.vmem_to_hbm [thread:$0]  (%p2297_p3), %s3173_s7, 2048, %s3171_s8, %s3179_s9, %s2225_s15, %s2225_s15, %s2223_s6  }
 0x23e PF: > { %p2056_p4 = scmp.ge.s32.totalorder %s2219_s19, 2  ;;  %s1665_s16 = sand.u32 1, %s2191_s12  }
 0x23f   : > { %s1666_s10 = scalar_lea.sflag [#allocation3], %s1665_s16 }
 0x240   : > { %p2053_p5 = pnand %p2056_p4, %p2306_p8 }
 0x242   : > { %2186 = dma.done.wait (!%p2053_p5), %s1666_s10, 2048  }
 0x243   : > { %2188 = vsyncadd (!%p2053_p5), %s1666_s10, 4294965248  ;;  %s16_s19 = sadd.s32 1, %s2219_s19   ;;  %s3282_s12 = smov %s2195_s13 }
 0x244   : > { %p13_p6 = scmp.ge.s32.totalorder %s16_s19, 6   ;;  %s3283_s13 = smov %s2199_s14 }
 0x245   : > { %s3284_s14 = smov %s2315_s30  ;;  %s3285_s15 = smov %s2211_s17 }
 0x246   : > { %s3286_s16 = smov %s2215_s18  ;;  %s3287_s17 = smov %s3290_s22 }
 0x247   : > { %s3288_s18 = smov %s3294_s23  ;;  %15 = sbr.rel (!%p13_p6) target bundleno = 5 (0x5), region = 72 }
 0x24e   :  { %1671 = vsyncpa [#allocation3], 1 }
 0x24f   :  { %1673 = vsyncpa [#allocation3 + $0x1], 1 }

// kernel: tpu_custom_call.1
= control target key start
LH: loop header
LB: loop body
LE: loop exit
PB: predicated region body
PF: predicated region fallthrough
CT: control target
= control target key end

     0   :  { %8 = vsyncpa [#allocation3], 0  ;;  %s3232_s0 = inlined_call_operand.vmem [shape: f32[2,18,18,4], index: 0, kind: input, shape index: {}]   ;;  %s3233_s1 = inlined_call_operand.vmem [shape: f32[3,12,128], index: 1, kind: input, shape index: {}]   ;;  %s3234_s2 = inlined_call_operand.vmem [shape: f32[1,128], index: 2, kind: input, shape index: {}]   ;;  %s3235_s3 = inlined_call_operand.hbm [shape: f32[2,256,128], index: 3, kind: output, shape index: {}]  }
   0x1   :  { %10 = vsyncpa [#allocation3 + $0x1], 0  ;;  %s2246_s12 = smov 0   ;;  %s2248_s13 = smov 0  }
   0x2   :  { %s2250_s14 = smov 0   ;;  %s2252_s15 = smov 0  }
   0x3   :  { %s2254_s16 = smov 0   ;;  %s2256_s17 = smov 0  }
   0x4   :  { %s2258_s18 = smov 0   ;;  %s2260_s19 = smov 0  }
   0x5 LB: > { %s1736_s20 = sadd.s32 4294967295, %s2219_s19   ;;  %s1737_s21 = sadd.s32 4294967294, %s2219_s19   ;;  %s2219_s19 = sphi %s2260_s19, %s16_s19   ;;  %s2215_s18 = sphi %s2258_s18, %s3288_s18   ;;  %s2211_s17 = sphi %s2256_s17, %s3287_s17   ;;  %s2207_s16 = sphi %s2254_s16, %s3286_s16   ;;  %s2203_s15 = sphi %s2252_s15, %s3285_s15   ;;  %s2199_s14 = sphi %s2250_s14, %s3284_s14   ;;  %s2195_s13 = sphi %s2248_s13, %s3283_s13   ;;  %s2191_s12 = sphi %s2246_s12, %s3282_s12  }
   0x6   : > { %s25_s22 = sadd.s32 1, %s2211_s17  ;;  %s28_s23 = sadd.s32 1, %s2215_s18 }
   0x7   : > { %p26_p0 = scmp.ge.s32.totalorder %s25_s22, 2  ;;  %p115_p1 = scmp.ne.s32.totalorder %s2199_s14, %s2195_s13 }
   0x8   : > { %p116_p2 = scmp.eq.s32.totalorder %s1736_s20, 3  ;;  %p121_p5 = scmp.ne.s32.totalorder %s2195_s13, %s2191_s12 }
   0x9   : > { %s3290_s22 = smov (%p26_p0, %s25_s22), 0  ;;  %s3292_s23 = smov (!%p26_p0, %s28_s23), %s2215_s18 }
   0xa   : > { %s101_s24 = ssub.s32 %s2211_s17, %s3290_s22  ;;  %p2297_p3 = por %p116_p2, %p115_p1 }
   0xb   : > { %p30_p4 = scmp.ge.s32.totalorder %s3292_s23, 2  ;;  %p122_p6 = scmp.eq.s32.totalorder %s1737_s21, 3 }
   0xc   : > { %p1740_p7 = scmp.ge.s32.totalorder %s2219_s19, 1  ;;  %p154_p9 = scmp.lt.s32.totalorder %s2219_s19, 5 }
   0xd   : > { %s3294_s23 = smov (%p30_p4, %s3292_s23), 0  ;;  %p2306_p8 = por %p122_p6, %p121_p5 }
   0xe   : > { %s100_s27 = ssub.s32 %s2215_s18, %s3294_s23  ;;  %s105_s28 = sadd.s32 1, %s2199_s14 }
   0xf   : > { %s102_s29 = sor.u32 %s101_s24, %s100_s27  ;;  %p155_p10 = pnand %p1740_p7, %p154_p9 }
  0x10   : > { %p103_p11 = scmp.eq.s32.totalorder %s102_s29, 0 }
  0x11   : > { %158 = sbr.rel (%p155_p10) target bundleno = 574 (0x23e), region = 32 }
  0x12   : > { %s2315_s30 = scalar_select %p103_p11, %s2199_s14, %s105_s28  }
  0x18   : > { %p178_p12 = scmp.lt.s32.totalorder %s2207_s16, 1  ;;  %s1744_s5 = smul.u32 192, %s2203_s15  ;;  %v1771_v0 = vld [vmem:[%s3233_s1 + $0x10] sm:$0xff]  ;;  %v1772_v1 = vld [vmem:[%s3233_s1 + $0x18] sm:$0xf]  ;;  %v447_v2 = vld [vmem:[%s3233_s1] sm:$0xff] }
  0x19   : > { %vm760_vm0 = vcmask 1043456   ;;  %v1997_v3 = vpack.c.bf16 %v1772_v1, %v1771_v0  ;;  %v448_v4 = vld [vmem:[%s3233_s1 + $0x8] sm:$0xf]  ;;  %vm235_vm1 = vcmask 1046528   ;;  %vm2221_vm2 = vmmov 1   ;;  %s175_s11 = sand.u32 1, %s2195_s13  }
  0x1a   : > { %s179_s4 = scalar_select %p178_p12, %s2207_s16, 1  ;;  %v2344_v8 = vpack.c.bf16 %v448_v4, %v447_v2  ;;  %vm2356_vm3 = vmpackc.low %vm760_vm0, %vm2221_vm2  ;;  %vm324_vm4 = vcmask 1045504   ;;  %vm413_vm5 = vcmask 31744   ;;  %vm430_vm6 = vcmask 64512  }
  0x1b   : > { %1999 = vmatprep.subr.msk.bf16.mxu1 %vm2356_vm3, %v1997_v3  ;;  %vm711_vm7 = vcmask 97280   ;;  %s1741_s24 = sshll.u32 %s175_s11, 7  ;;  %s1855_s29 = sshll.u32 %s2207_s16, 5 }
  0x1c   : > { %s2049_s6 = smul.u32 432, %s179_s4  ;;  %2005 = vmatprep.subr.msk.bf16.mxu0 %vm2356_vm3, %v2344_v8  ;;  %2002 = vmatpush3.bf16.msk.msra.mxu1 %vm2356_vm3, %v1997_v3  ;;  %s3135_s27 = scalar_lea.vmem [#allocation2], %s1741_s24 }
  0x1d   : > { %2008 = vmatpush3.bf16.msk.msra.mxu0 %vm2356_vm3, %v2344_v8  ;;  %2015 = vmatprep.subr.msk.bf16.mxu1 %vm2356_vm3, %v2344_v8  ;;  %s1650_s7 = sshll.u32 %s3135_s27, 4  ;;  %s2224_s20 = smov [#allocation2]   ;;  %s3173_s7 = int_to_ptr.vmem [resolvable:$true] %s1650_s7 }
  0x1e   : > { %s182_s9 = scalar_lea.vmem %s3232_s0, %s2049_s6  ;;  %s2223_s6 = smov 8  }
  0x1f   : > { %s2332_s28 = scalar_lea.vmem %s182_s9, %s1744_s5  ;;  %s2222_s5 = smov 4  }
  0x20   : > { %v2338_v5 = vld [vmem:[%s2332_s28 + $0x8] sm:$0xff]  ;;  %v189_v6 = vld [vmem:[%s2332_s28 + $0x10] sm:$0x3]  ;;  %v2342_v7 = vld [vmem:[%s2332_s28] sm:$0xff]  ;;  %s3179_s9 = scalar_lea.sflag [#allocation3], %s175_s11  ;;  %s2125_s10 = scalar_lea.vmem %s3173_s7, 2048 }
  0x21   : > { %v237_v9 = vrot.slane %v2338_v5, 1  ;;  %v239_v10 = vrot.slane %v189_v6, 1  ;;  %v236_v11 = vrot.slane %v2342_v7, 1  ;;  %v325_v12 = vrot.slane %v2342_v7, 2  ;;  %v2350_v13 = vld [vmem:[%s2332_s28 + $0x18] sm:$0xff]  ;;  %v2353_v14 = vld [vmem:[%s2332_s28 + $0x20] sm:$0xff]  ;;  %p2126_p13 = scmp.ne.s32.totalorder %s3173_s7, %s2125_s10 }
  0x22   : > { %v326_v16 = vrot.slane %v2338_v5, 2  ;;  %v500_v17 = vrot.slane %v2350_v13, 1  ;;  %v501_v18 = vrot.slane %v2353_v14, 1  ;;  %v1749_v19 = vld [vmem:[%s2332_s28 + $0x28] sm:$0x3]  ;;  %v588_v22 = vrot.slane %v2350_v13, 2 }
  0x23   : > { %v240_v20 = vsel %vm235_vm1, %v237_v9, %v239_v10  ;;  %v238_v21 = vsel %vm235_vm1, %v236_v11, %v237_v9  ;;  %v2382_v25 = vrot.slane %v2353_v14, 2  ;;  %v503_v26 = vrot.slane %v1749_v19, 1  ;;  %v2395_v31 = vld [vmem:[%s2332_s28 + $0x30] sm:$0xff]  ;;  %v2398_v32 = vld [vmem:[%s2332_s28 + $0x38] sm:$0xff]  ;;  %v2404_v33 = vld [vmem:[%s2332_s28 + $0x28] sm:$0x3]  ;;  %p2127_p0 = pnand %p2126_p13, %p2297_p3 }
  0x24   : > { %278 = vrot.lane.b32.xlu1 %v240_v20, %s2222_s5  ;;  %276 = vrot.lane.b32.xlu0 %v238_v21, %s2222_s5  ;;  %v327_v23 = vsel %vm324_vm4, %v325_v12, %v326_v16  ;;  %v502_v24 = vsel %vm235_vm1, %v500_v17, %v501_v18  ;;  %v591_v29 = vrot.slane %v1749_v19, 2  ;;  %v328_v30 = vrot.slane %v189_v6, 2  ;;  %v2414_v38 = vld [vmem:[%s2332_s28 + $0x40] sm:$0x3]  ;;  %v1761_v40 = vld [vmem:[%s2332_s28 + $0x88] sm:$0x3] }
  0x25   : > { %v2391_v27 = vsel %vm324_vm4, %v588_v22, %v2382_v25  ;;  %v504_v28 = vsel %vm235_vm1, %v501_v18, %v503_v26  ;;  %v505_v36 = vrot.slane %v2395_v31, 1  ;;  %v2411_v37 = vrot.slane %v2398_v32, 1  ;;  %v2417_v39 = vld [vmem:[%s2332_s28 + $0x80] sm:$0xff]  ;;  %v2430_v46 = vld [vmem:[%s2332_s28 + $0x50] sm:$0xff]  ;;  %v2441_v51 = vld [vmem:[%s2332_s28 + $0x98] sm:$0xff]  ;;  %p2128_p1 = pneg %p2127_p0  ;;  %s2129_s21 = sshll.u32 %s2224_s20, 4  ;;  %s2130_s21 = int_to_ptr.vmem [resolvable:$false] %s2129_s21 }
  0x26   : > { %v592_v34 = vsel %vm324_vm4, %v2382_v25, %v591_v29  ;;  %v329_v35 = vsel %vm324_vm4, %v326_v16, %v328_v30  ;;  %3255 = vst [vmem:[#allocation5_spill] sm:$0xff] %v2417_v39  ;;  %v244_v41 = vrot.slane %v2404_v33, 1  ;;  %v1811_v42 = vld [vmem:[%s2332_s28 + $0x40] sm:$0x3]  ;;  %v593_v43 = vrot.slane %v2395_v31, 2  ;;  %3256 = vst [vmem:[#allocation6_spill] sm:$0xff] %v2430_v46  ;;  %p2132_p2 = scmp.lt.s32.totalorder %s3173_s7, %s2130_s21 }
  0x27   : > { %v2426_v44 = vrot.slane %v2398_v32, 2  ;;  %v508_v45 = vrot.slane %v2414_v38, 1  ;;  %v2434_v47 = vsel %vm235_vm1, %v505_v36, %v2411_v37  ;;  %v596_v48 = vrot.slane %v2414_v38, 2  ;;  %3257 = vst [vmem:[#allocation7_spill] sm:$0xff] %v2441_v51  ;;  %v1764_v52 = vld [vmem:[%s2332_s28 + $0xa0] sm:$0x3] }
  0x28   : > { %365 = vrot.lane.b32.xlu1 %v327_v23, %s2223_s6  ;;  %540 = vrot.lane.b32.xlu0 %v502_v24, %s2222_s5  ;;  %v2438_v49 = vrot.slane %v2417_v39, 1  ;;  %v523_v50 = vrot.slane %v1761_v40, 1  ;;  %v2445_v53 = vrot.slane %v2417_v39, 2  ;;  %v1159_v54 = vrot.slane %v1811_v42, 1  ;;  %v1814_v57 = vld [vmem:[%s2332_s28 + $0x58] sm:$0x3] }
  0x29   : > { %v1247_v55 = vrot.slane %v1811_v42, 2  ;;  %v611_v56 = vrot.slane %v1761_v40, 2  ;;  %v245_v58 = vsel %vm235_vm1, %v501_v18, %v244_v41  ;;  %v333_v59 = vrot.slane %v2404_v33, 2  ;;  %v2464_v63 = vld [vmem:[%s2332_s28 + $0x68] sm:$0xff]  ;;  %v2479_v3 = vld [vmem:[%s2332_s28 + $0xb0] sm:$0xff]  ;;  %s2131_s24 = scalar_lea.vmem %s2130_s21, 4096 }
  0x2a   : > { %v2451_v60 = vrot.slane %v2430_v46, 1  ;;  %v2455_v61 = vsel %vm235_vm1, %v2438_v49, %v523_v50  ;;  %v2461_v62 = vrot.slane %v2430_v46, 2  ;;  %3258 = vst [vmem:[#allocation8_spill] sm:$0xff] %v2464_v63  ;;  %v2468_v0 = vsel %vm235_vm1, %v2411_v37, %v1159_v54  ;;  %3259 = vst [vmem:[#allocation9_spill] sm:$0xff] %v2479_v3  ;;  %v1767_v11 = vld [vmem:[%s2332_s28 + $0xb8] sm:$0x3]  ;;  %p2133_p4 = scmp.lt.s32.totalorder %s2131_s24, %s2125_s10 }
  0x2b   : > { %v2472_v1 = vsel %vm324_vm4, %v2426_v44, %v1247_v55  ;;  %v2476_v2 = vsel %vm324_vm4, %v2445_v53, %v611_v56  ;;  %v2482_v4 = vrot.slane %v2441_v51, 1  ;;  %v528_v6 = vrot.slane %v1764_v52, 1  ;;  %v1817_v19 = vld [vmem:[%s2332_s28 + $0x70] sm:$0x3]  ;;  %v2496_v20 = vld [vmem:[%s2332_s28 + $0x48] sm:$0xff] }
  0x2c   : > { %628 = vrot.lane.b32.xlu1 %v2391_v27, %s2223_s6  ;;  %542 = vrot.lane.b32.xlu0 %v504_v28, %s2222_s5  ;;  %v1164_v9 = vrot.slane %v1814_v57, 1  ;;  %v1252_v10 = vrot.slane %v1814_v57, 2  ;;  %v2487_v12 = vsel %vm324_vm4, %v593_v43, %v2426_v44  ;;  %v509_v16 = vsel %vm235_vm1, %v2411_v37, %v508_v45  ;;  %v2527_v33 = vld [vmem:[%s2332_s28 + $0xc8] sm:$0xff]  ;;  %v201_v45 = vld [vmem:[%s2332_s28 + $0x70] sm:$0x3]  ;;  %p2134_p5 = por %p2133_p4, %p2132_p2 }
  0x2d   : > { %v2492_v17 = vrot.slane %v2441_v51, 2  ;;  %v616_v18 = vrot.slane %v1764_v52, 2  ;;  %v2499_v21 = vrot.slane %v2464_v63, 1  ;;  %v2503_v22 = vsel %vm235_vm1, %v2482_v4, %v528_v6  ;;  %3260 = vst [vmem:[#allocation10_spill] sm:$0xff] %v2527_v33  ;;  %v1820_v40 = vld [vmem:[%s2332_s28 + $0x88] sm:$0x3] }
  0x2e   : > { %v2507_v23 = vsel %vm235_vm1, %v2451_v60, %v1164_v9  ;;  %v2517_v26 = vrot.slane %v2464_v63, 2  ;;  %v2524_v29 = vrot.slane %v2479_v3, 1  ;;  %v533_v30 = vrot.slane %v1767_v11, 1  ;;  %v1823_v50 = vld [vmem:[%s2332_s28 + $0xa0] sm:$0x3]  ;;  %p2135_p6 = pnand %p2134_p5, %p2128_p1 }
  0x2f   : > { %v2521_v28 = vsel %vm324_vm4, %v2492_v17, %v616_v18  ;;  %v1257_v36 = vrot.slane %v1817_v19, 2  ;;  %v621_v38 = vrot.slane %v1767_v11, 2  ;;  %v597_v41 = vsel %vm324_vm4, %v2426_v44, %v596_v48  ;;  %v1826_v18 = vld [vmem:[%s2332_s28 + $0xb8] sm:$0x3]  ;;  %v1829_v39 = vld [vmem:[%s2332_s28 + $0xd0] sm:$0x3] }
  0x30   : > { %630 = vrot.lane.b32.xlu1 %v592_v34, %s2223_s6  ;;  %367 = vrot.lane.b32.xlu0 %v329_v35, %s2223_s6  ;;  %v1770_v34 = vld [vmem:[%s2332_s28 + $0xd0] sm:$0x3]  ;;  %v1169_v35 = vrot.slane %v1817_v19, 1  ;;  %v510_v42 = vrot.slane %v2496_v20, 1  ;;  %v2539_v43 = vsel %vm235_vm1, %v2524_v29, %v533_v30  ;;  %v334_v52 = vsel %vm324_vm4, %v2382_v25, %v333_v59  ;;  %v204_v59 = vld [vmem:[%s2332_s28 + $0x88] sm:$0x3] }
  0x31   : > { %v2551_v48 = vsel %vm324_vm4, %v2517_v26, %v1257_v36  ;;  %v2561_v25 = vrot.slane %v2527_v33, 1  ;;  %v538_v56 = vrot.slane %v1770_v34, 1  ;;  %v1174_v57 = vrot.slane %v1820_v40, 1  ;;  %v195_v19 = vld [vmem:[%s2332_s28 + $0x40] sm:$0x3] }
  0x32   : > { %v2547_v54 = vsel %vm235_vm1, %v2499_v21, %v1169_v35  ;;  %v2565_v6 = vrot.slane %v2527_v33, 2  ;;  %v626_v9 = vrot.slane %v1770_v34, 2  ;;  %v1179_v11 = vrot.slane %v1823_v50, 1  ;;  %v2647_v63 = vld [vmem:[%s2332_s28 + $0x60] sm:$0xff] }
  0x33   : > { %v2571_v30 = vsel %vm235_vm1, %v2561_v25, %v538_v56  ;;  %v1267_v36 = vrot.slane %v1823_v50, 2  ;;  %v348_v56 = vrot.slane %v201_v45, 2  ;;  %v249_v33 = vrot.slane %v195_v19, 1  ;;  %3264 = vst [vmem:[#allocation14_spill] sm:$0xff] %v2647_v63 }
  0x34   : > { %544 = vrot.lane.b32.xlu1 %v2434_v47, %s2222_s5  ;;  %280 = vrot.lane.b32.xlu0 %v502_v24, %s2222_s5  ;;  %v2511_v24 = vsel %vm324_vm4, %v2461_v62, %v1252_v10  ;;  %v259_v10 = vrot.slane %v201_v45, 1  ;;  %v2583_v34 = vsel %vm324_vm4, %v2565_v6, %v626_v9  ;;  %v1272_v9 = vrot.slane %v1826_v18, 2 }
  0x35   : > { %v2597_v50 = vsel %vm324_vm4, %v2492_v17, %v1267_v36  ;;  %v2605_v45 = vsel %vm324_vm4, %v2517_v26, %v348_v56  ;;  %v598_v56 = vrot.slane %v2496_v20, 2  ;;  %v338_v51 = vrot.slane %v195_v19, 2 }
  0x36   : > { %v1189_v46 = vrot.slane %v1829_v39, 1 }
  0x37   : > { %v339_v19 = vsel %vm324_vm4, %v2426_v44, %v338_v51 }
  0x38   : > { %369 = vrot.lane.b32.xlu1 %v2391_v27, %s2223_s6  ;;  %282 = vrot.lane.b32.xlu0 %v245_v58, %s2222_s5  ;;  %v2531_v27 = vrot.slane %v2479_v3, 2  ;;  %v1262_v58 = vrot.slane %v1820_v40, 2  ;;  %v2591_v40 = vsel %vm235_vm1, %v2482_v4, %v1179_v11  ;;  %v1755_v11 = vld [vmem:[%s2332_s28 + $0x58] sm:$0x3]  ;;  %v2641_v3 = vsel %vm324_vm4, %v598_v56, %v2461_v62 }
  0x3a   : > { %v2555_v55 = vsel %vm324_vm4, %v2531_v27, %v621_v38  ;;  %v2579_v35 = vsel %vm324_vm4, %v2445_v53, %v1262_v58  ;;  %v2587_v38 = vsel %vm235_vm1, %v2499_v21, %v259_v10  ;;  %v1184_v58 = vrot.slane %v1826_v18, 1 }
  0x3b   : > { %v2601_v10 = vsel %vm235_vm1, %v510_v42, %v2451_v60  ;;  %v2618_v18 = vsel %vm324_vm4, %v2531_v27, %v1272_v9 }
  0x3c   : > { %632 = vrot.lane.b32.xlu1 %v2487_v12, %s2223_s6  ;;  %546 = vrot.lane.b32.xlu0 %v509_v16, %s2222_s5  ;;  %v2575_v16 = vsel %vm235_vm1, %v2438_v49, %v1174_v57  ;;  %v264_v57 = vrot.slane %v204_v59, 1  ;;  %v2614_v36 = vsel %vm235_vm1, %v2524_v29, %v1184_v58  ;;  %3261 = vst [vmem:[#allocation11_spill] sm:$0xff] %v2618_v18  ;;  %v207_v58 = vld [vmem:[%s2332_s28 + $0xa0] sm:$0x3] }
  0x3d   : > { %v269_v9 = vrot.slane %v207_v58, 1 }
  0x40   : > { %634 = vrot.lane.b32.xlu1 %v597_v41, %s2223_s6  ;;  %371 = vrot.lane.b32.xlu0 %v334_v52, %s2223_s6  ;;  %v353_v41 = vrot.slane %v204_v59, 2  ;;  %v2610_v52 = vsel %vm235_vm1, %v2438_v49, %v264_v57  ;;  %v250_v59 = vsel %vm235_vm1, %v2411_v37, %v249_v33  ;;  %v513_v57 = vrot.slane %v1755_v11, 1 }
  0x41   : > { %v601_v33 = vrot.slane %v1755_v11, 2  ;;  %v515_v11 = vrot.slane %v2647_v63, 1 }
  0x42   : > { %v2622_v42 = vsel %vm324_vm4, %v2445_v53, %v353_v41  ;;  %v2637_v41 = vsel %vm235_vm1, %v2482_v4, %v269_v9  ;;  %v514_v37 = vsel %vm235_vm1, %v2451_v60, %v513_v57  ;;  %v198_v57 = vld [vmem:[%s2332_s28 + $0x58] sm:$0x3]  ;;  %v1277_v9 = vrot.slane %v1829_v39, 2  ;;  %v1758_v39 = vld [vmem:[%s2332_s28 + $0x70] sm:$0x3] }
  0x43   : > { %3262 = vst [vmem:[#allocation12_spill] sm:$0xff] %v2622_v42  ;;  %3263 = vst [vmem:[#allocation13_spill] sm:$0xff] %v2637_v41  ;;  %v602_v56 = vsel %vm324_vm4, %v2461_v62, %v601_v33  ;;  %v358_v41 = vrot.slane %v207_v58, 2  ;;  %v2674_v44 = vsel %vm235_vm1, %v515_v11, %v2499_v21  ;;  %v254_v51 = vrot.slane %v198_v57, 1  ;;  %v2686_v11 = vld [vmem:[%s2332_s28 + $0xe0] sm:$0xff] }
  0x44   : > { %548 = vrot.lane.b32.xlu1 %v2601_v10, %s2222_s5  ;;  %284 = vrot.lane.b32.xlu0 %v2434_v47, %s2222_s5  ;;  %v518_v33 = vrot.slane %v1758_v39, 1  ;;  %v3250_v42 = vrot.slane %v2686_v11, 1 }
  0x45   : > { %v255_v58 = vsel %vm235_vm1, %v2451_v60, %v254_v51  ;;  %v606_v51 = vrot.slane %v1758_v39, 2 }
  0x46   : > { %v519_v60 = vsel %vm235_vm1, %v2499_v21, %v518_v33  ;;  %v1833_v33 = vld [vmem:[%s3233_s1 + $0x20] sm:$0xff] }
  0x47   : > { %v607_v21 = vsel %vm324_vm4, %v2517_v26, %v606_v51 }
  0x48   : > { %373 = vrot.lane.b32.xlu1 %v2487_v12, %s2223_s6  ;;  %286 = vrot.lane.b32.xlu0 %v250_v59, %s2222_s5  ;;  %v2654_v59 = vsel %vm235_vm1, %v2561_v25, %v1189_v46  ;;  %v2666_v46 = vsel %vm324_vm4, %v2565_v6, %v1277_v9 }
  0x49   : > { %3265 = vst [vmem:[#allocation15_spill] sm:$0xff] %v2654_v59  ;;  %3266 = vst [vmem:[#allocation16_spill] sm:$0xff] %v2666_v46  ;;  %v343_v46 = vrot.slane %v198_v57, 2  ;;  %v2703_v59 = vld [vmem:[%s2332_s28 + $0x78] sm:$0xff] }
  0x4a   : > { %v520_v39 = vrot.slane %v2703_v59, 1 }
  0x4b   : > { %v344_v57 = vsel %vm324_vm4, %v2461_v62, %v343_v46 }
  0x4c   : > { %636 = vrot.lane.b32.xlu1 %v2641_v3, %s2223_s6  ;;  %550 = vrot.lane.b32.xlu0 %v514_v37, %s2222_s5  ;;  %v2670_v37 = vsel %vm324_vm4, %v2492_v17, %v358_v41  ;;  %v603_v41 = vrot.slane %v2647_v63, 2  ;;  %v1832_v63 = vld [vmem:[%s2332_s28 + $0xe8] sm:$0x3]  ;;  %v2741_v46 = vsel %vm235_vm1, %v520_v39, %v2438_v49  ;;  %v2760_v49 = vld [vmem:[%s2332_s28 + $0x90] sm:$0xff] }
  0x4d   : > { %3267 = vst [vmem:[#allocation17_spill] sm:$0xff] %v2670_v37  ;;  %v1194_v18 = vrot.slane %v1832_v63, 1 }
  0x4e   : > { %v2697_v37 = vsel %vm324_vm4, %v603_v41, %v2517_v26  ;;  %v1280_v41 = vrot.slane %v2686_v11, 2 }
  0x50   : > { %638 = vrot.lane.b32.xlu1 %v602_v56, %s2223_s6  ;;  %375 = vrot.lane.b32.xlu0 %v339_v19, %s2223_s6  ;;  %v210_v56 = vld [vmem:[%s2332_s28 + $0xb8] sm:$0x3] }
  0x51   : > { %v274_v19 = vrot.slane %v210_v56, 1 }
  0x53   : > { %v2693_v9 = vsel %vm235_vm1, %v2524_v29, %v274_v19  ;;  %v1834_v19 = vld [vmem:[%s3233_s1 + $0x28] sm:$0xf] }
  0x54   : > { %552 = vrot.lane.b32.xlu1 %v2674_v44, %s2222_s5  ;;  %288 = vrot.lane.b32.xlu0 %v2601_v10, %s2222_s5 }
  0x58   : > { %377 = vrot.lane.b32.xlu1 %v2641_v3, %s2223_s6  ;;  %290 = vrot.lane.b32.xlu0 %v255_v58, %s2222_s5  ;;  %v2712_v58 = vsel %vm235_vm1, %v3250_v42, %v1194_v18  ;;  %v1282_v18 = vrot.slane %v1832_v63, 2  ;;  %v2726_v42 = vpack.c.bf16 %v1834_v19, %v1833_v33  ;;  %v608_v63 = vrot.slane %v2703_v59, 2 }
  0x5a   : > { %v2733_v62 = vsel %vm324_vm4, %v1280_v41, %v1282_v18  ;;  %2011 = vmatprep.subr.msk.bf16.mxu0 %vm2356_vm3, %v2726_v42 }
  0x5c   : > { %640 = vrot.lane.b32.xlu1 %v2697_v37, %s2223_s6  ;;  %554 = vrot.lane.b32.xlu0 %v519_v60, %s2222_s5  ;;  %v363_v60 = vrot.slane %v210_v56, 2  ;;  %v2753_v56 = vsel %vm324_vm4, %v608_v63, %v2445_v53 }
  0x5e   : > { %v2737_v26 = vsel %vm324_vm4, %v2531_v27, %v363_v60 }
  0x60   : > { %642 = vrot.lane.b32.xlu1 %v607_v21, %s2223_s6  ;;  %379 = vrot.lane.b32.xlu0 %v344_v57, %s2223_s6 }
  0x64   : > { %1196 = vrot.lane.b32.xlu1 %v2434_v47, %s2222_s5  ;;  %556 = vrot.lane.b32.xlu0 %v2741_v46, %s2222_s5  ;;  %v525_v47 = vrot.slane %v2760_v49, 1 }
  0x66   : > { %v2773_v53 = vsel %vm235_vm1, %v525_v47, %v2482_v4 }
  0x68   : > { %644 = vrot.lane.b32.xlu1 %v2753_v56, %s2223_s6  ;;  %558 = vrot.lane.b32.xlu0 %v2455_v61, %s2222_s5  ;;  %v613_v61 = vrot.slane %v2760_v49, 2 }
  0x6c   : > { %1284 = vrot.lane.b32.xlu1 %v2487_v12, %s2223_s6  ;;  %1198 = vrot.lane.b32.xlu0 %v2468_v0, %s2222_s5  ;;  %v2782_v0 = vsel %vm324_vm4, %v613_v61, %v2492_v17  ;;  %v2818_v17 = vld [vmem:[%s2332_s28 + $0xc0] sm:$0xff] }
  0x70   : > { %1286 = vrot.lane.b32.xlu1 %v2472_v1, %s2223_s6  ;;  %646 = vrot.lane.b32.xlu0 %v2476_v2, %s2223_s6  ;;  %v2789_v1 = vld [vmem:[%s2332_s28 + $0xa8] sm:$0xff] }
  0x71   : > { %v530_v2 = vrot.slane %v2789_v1, 1  ;;  %v618_v12 = vrot.slane %v2789_v1, 2 }
  0x73   : > { %v2802_v4 = vsel %vm235_vm1, %v530_v2, %v2524_v29 }
  0x74   : > { %1200 = vrot.lane.b32.xlu1 %v2601_v10, %s2222_s5  ;;  %560 = vrot.lane.b32.xlu0 %v2773_v53, %s2222_s5 }
  0x78   : > { %648 = vrot.lane.b32.xlu1 %v2782_v0, %s2223_s6  ;;  %562 = vrot.lane.b32.xlu0 %v2503_v22, %s2222_s5  ;;  %v535_v22 = vrot.slane %v2818_v17, 1 }
  0x7c   : > { %1288 = vrot.lane.b32.xlu1 %v2641_v3, %s2223_s6  ;;  %1202 = vrot.lane.b32.xlu0 %v2507_v23, %s2222_s5  ;;  %v2811_v3 = vsel %vm324_vm4, %v618_v12, %v2531_v27  ;;  %v2831_v23 = vsel %vm235_vm1, %v535_v22, %v2561_v25  ;;  %v3268_v22 = vld [vmem:[#allocation11_spill] sm:$0xff] }
  0x80   : > { %1290 = vrot.lane.b32.xlu1 %v2511_v24, %s2223_s6  ;;  %650 = vrot.lane.b32.xlu0 %v2521_v28, %s2223_s6  ;;  %v623_v24 = vrot.slane %v2818_v17, 2 }
  0x82   : > { %v2840_v28 = vsel %vm324_vm4, %v623_v24, %v2565_v6  ;;  %v3269_v24 = vld [vmem:[#allocation12_spill] sm:$0xff] }
  0x84   : > { %1204 = vrot.lane.b32.xlu1 %v2674_v44, %s2222_s5  ;;  %564 = vrot.lane.b32.xlu0 %v2802_v4, %s2222_s5 }
  0x88   : > { %652 = vrot.lane.b32.xlu1 %v2811_v3, %s2223_s6  ;;  %566 = vrot.lane.b32.xlu0 %v2539_v43, %s2222_s5 }
  0x8c   : > { %1292 = vrot.lane.b32.xlu1 %v2697_v37, %s2223_s6  ;;  %1206 = vrot.lane.b32.xlu0 %v2547_v54, %s2222_s5 }
  0x90   : > { %1294 = vrot.lane.b32.xlu1 %v2551_v48, %s2223_s6  ;;  %654 = vrot.lane.b32.xlu0 %v2555_v55, %s2223_s6 }
  0x94   : > { %1208 = vrot.lane.b32.xlu1 %v2741_v46, %s2222_s5  ;;  %568 = vrot.lane.b32.xlu0 %v2831_v23, %s2222_s5 }
  0x96   : > { %v279_v29 = vpop.permute.xlu1 %278  ;;  %v277_v27 = vpop.permute.xlu0 %276 }
  0x97   : > { %v414_v43 = vsel %vm413_vm5, %v2342_v7, %v277_v27 }
  0x98   : > { %656 = vrot.lane.b32.xlu1 %v2840_v28, %s2223_s6  ;;  %570 = vrot.lane.b32.xlu0 %v2571_v30, %s2222_s5 }
  0x9a   : > { %v366_v54 = vpop.permute.xlu1 %365  ;;  %v541_v48 = vpop.permute.xlu0 %540 }
  0x9b   : > { %v431_v55 = vsel %vm430_vm6, %v414_v43, %v366_v54  ;;  %v676_v25 = vsel %vm413_vm5, %v2350_v13, %v541_v48 }
  0x9c   : > { %1296 = vrot.lane.b32.xlu1 %v2753_v56, %s2223_s6  ;;  %1210 = vrot.lane.b32.xlu0 %v2575_v16, %s2222_s5  ;;  %v415_v16 = vsel %vm413_vm5, %v2338_v5, %v279_v29  ;;  %v3270_v29 = vld [vmem:[#allocation6_spill] sm:$0xff] }
  0x9d   : > { %1945 = vmatprep.mubr.msk.f32.mxu0 %vm711_vm7, %v431_v55 }
  0x9e   : > { %v629_v6 = vpop.permute.xlu1 %628  ;;  %v543_v30 = vpop.permute.xlu0 %542 }
  0x9f   : > { %v692_v7 = vsel %vm430_vm6, %v676_v25, %v629_v6  ;;  %v677_v10 = vsel %vm413_vm5, %v2353_v14, %v543_v30  ;;  %v3271_v30 = vld [vmem:[#allocation13_spill] sm:$0xff] }
  0xa0   : > { %1298 = vrot.lane.b32.xlu1 %v2579_v35, %s2223_s6  ;;  %658 = vrot.lane.b32.xlu0 %v2583_v34, %s2223_s6 }
  0xa1   : > { %1917 = vmatprep.mubr.msk.f32.mxu1 %vm711_vm7, %v692_v7 }
  0xa2   : > { %v631_v51 = vpop.permute.xlu1 %630  ;;  %v368_v21 = vpop.permute.xlu0 %367 }
  0xa3   : > { %v693_v57 = vsel %vm430_vm6, %v677_v10, %v631_v51  ;;  %v432_v39 = vsel %vm430_vm6, %v415_v16, %v368_v21  ;;  %v2951_v10 = vld [vmem:[%s2332_s28 + $0xd8] sm:$0xff]  ;;  %v3272_v51 = vld [vmem:[#allocation15_spill] sm:$0xff]  ;;  %v3273_v21 = vld [vmem:[#allocation14_spill] sm:$0xff]  ;;  %s1854_s28 = sshll.u32 %s2203_s15, 4 }
  0xa4   : > { %1212 = vrot.lane.b32.xlu1 %v2773_v53, %s2222_s5  ;;  %292 = vrot.lane.b32.xlu0 %v2674_v44, %s2222_s5  ;;  %s1647_s4 = sadd.s32 %s1855_s29, %s1854_s28 }
  0xa5   : > { %1918 = vmatmul.mubr.msk.f32.vlgmr.msra.gmra.mrb[0].mxu1 %vm711_vm7, %v693_v57  ;;  %1946 = vmatmul.mubr.msk.f32.vlgmr.msra.gmra.mrb[0].mxu0 %vm711_vm7, %v432_v39 }
  0xa6   : > { %v545_v5 = vpop.permute.xlu1 %544  ;;  %v281_v35 = vpop.permute.xlu0 %280  ;;  %2014 = vmatpush3.bf16.msk.msra.mxu0 %vm2356_vm3, %v2726_v42  ;;  %2016 = vmatpush3.bf16.msk.msra.mxu1 %vm2356_vm3, %v2344_v8 }
  0xa7   : > { %v416_v34 = vsel %vm413_vm5, %v2350_v13, %v281_v35  ;;  %v678_v8 = vsel %vm413_vm5, %v2395_v31, %v545_v5 }
  0xa8   : > { %381 = vrot.lane.b32.xlu1 %v2697_v37, %s2223_s6  ;;  %294 = vrot.lane.b32.xlu0 %v2587_v38, %s2222_s5 }
  0xaa   : > { %v370_v44 = vpop.permute.xlu1 %369  ;;  %v283_v33 = vpop.permute.xlu0 %282 }
  0xab   : > { %v433_v19 = vsel %vm430_vm6, %v416_v34, %v370_v44  ;;  %v417_v13 = vsel %vm413_vm5, %v2353_v14, %v283_v33  ;;  %v3274_v34 = vld [vmem:[#allocation16_spill] sm:$0xff]  ;;  %v3275_v44 = vld [vmem:[#allocation17_spill] sm:$0xff] }
  0xac   : > { %1300 = vrot.lane.b32.xlu1 %v2782_v0, %s2223_s6  ;;  %1214 = vrot.lane.b32.xlu0 %v2591_v40, %s2222_s5 }
  0xad   : > { %1948 = vmatprep.mubr.msk.f32.mxu0 %vm711_vm7, %v433_v19 }
  0xae   : > { %v633_v15 = vpop.permute.xlu1 %632  ;;  %v547_v38 = vpop.permute.xlu0 %546 }
  0xaf   : > { %v694_v42 = vsel %vm430_vm6, %v678_v8, %v633_v15  ;;  %v679_v40 = vsel %vm413_vm5, %v2398_v32, %v547_v38  ;;  %v3277_v8 = vld [vmem:[#allocation8_spill] sm:$0xff] }
  0xb0   : > { %1302 = vrot.lane.b32.xlu1 %v2597_v50, %s2223_s6  ;;  %383 = vrot.lane.b32.xlu0 %v2605_v45, %s2223_s6 }
  0xb1   : > { %1920 = vmatprep.mubr.msk.f32.mxu1 %vm711_vm7, %v694_v42 }
  0xb2   : > { %v635_v37 = vpop.permute.xlu1 %634  ;;  %v372_v18 = vpop.permute.xlu0 %371 }
  0xb3   : > { %v695_v60 = vsel %vm430_vm6, %v679_v40, %v635_v37  ;;  %v434_v63 = vsel %vm430_vm6, %v417_v13, %v372_v18  ;;  %v1279_v37 = vrot.slane %v2951_v10, 2 }
  0xb4   : > { %1216 = vrot.lane.b32.xlu1 %v2802_v4, %s2222_s5  ;;  %296 = vrot.lane.b32.xlu0 %v2741_v46, %s2222_s5 }
  0xb5   : > { %1921 = vmatmul.mubr.msk.f32.gmra.mrb[2].mxu1 %vm711_vm7, %v695_v60  ;;  %1949 = vmatmul.mubr.msk.f32.gmra.mrb[2].mxu0 %vm711_vm7, %v434_v63  ;;  %v1281_v63 = vsel %vm324_vm4, %v1279_v37, %v1280_v41 }
  0xb6   : > { %v549_v14 = vpop.permute.xlu1 %548  ;;  %v285_v50 = vpop.permute.xlu0 %284 }
  0xb7   : > { %v418_v45 = vsel %vm413_vm5, %v2395_v31, %v285_v50  ;;  %v680_v46 = vsel %vm413_vm5, %v2496_v20, %v549_v14 }
  0xb8   : > { %385 = vrot.lane.b32.xlu1 %v2753_v56, %s2223_s6  ;;  %298 = vrot.lane.b32.xlu0 %v2610_v52, %s2222_s5 }
  0xba   : > { %v374_v47 = vpop.permute.xlu1 %373  ;;  %v287_v61 = vpop.permute.xlu0 %286 }
  0xbb   : > { %v435_v2 = vsel %vm430_vm6, %v418_v45, %v374_v47 }
  0xbc   : > { %1304 = vrot.lane.b32.xlu1 %v2811_v3, %s2223_s6  ;;  %1218 = vrot.lane.b32.xlu0 %v2614_v36, %s2222_s5  ;;  %v419_v36 = vsel %vm413_vm5, %v2398_v32, %v287_v61  ;;  %v3278_v61 = vld [vmem:[#allocation5_spill] sm:$0xff] }
  0xbd   : > { %1951 = vmatprep.mubr.msk.f32.mxu0 %vm711_vm7, %v435_v2 }
  0xbe   : > { %v637_v56 = vpop.permute.xlu1 %636  ;;  %v551_v52 = vpop.permute.xlu0 %550 }
  0xbf   : > { %v696_v12 = vsel %vm430_vm6, %v680_v46, %v637_v56  ;;  %v681_v27 = vsel %vm413_vm5, %v3270_v29, %v551_v52 }
  0xc0   : > { %1306 = vrot.lane.b32.xlu1 %v3268_v22, %s2223_s6  ;;  %387 = vrot.lane.b32.xlu0 %v3269_v24, %s2223_s6 }
  0xc1   : > { %1923 = vmatprep.mubr.msk.f32.mxu1 %vm711_vm7, %v696_v12 }
  0xc2   : > { %v639_v43 = vpop.permute.xlu1 %638  ;;  %v376_v54 = vpop.permute.xlu0 %375 }
  0xc3   : > { %v697_v48 = vsel %vm430_vm6, %v681_v27, %v639_v43  ;;  %v436_v55 = vsel %vm430_vm6, %v419_v36, %v376_v54 }
  0xc4   : > { %1220 = vrot.lane.b32.xlu1 %v2831_v23, %s2222_s5  ;;  %300 = vrot.lane.b32.xlu0 %v2773_v53, %s2222_s5 }
  0xc5   : > { %1924 = vmatmul.mubr.msk.f32.gmra.mrb[4].mxu1 %vm711_vm7, %v697_v48  ;;  %1952 = vmatmul.mubr.msk.f32.gmra.mrb[4].mxu0 %vm711_vm7, %v436_v55  ;;  %v3279_v48 = vld [vmem:[#allocation7_spill] sm:$0xff] }
  0xc6   : > { %v553_v25 = vpop.permute.xlu1 %552  ;;  %v289_v6 = vpop.permute.xlu0 %288 }
  0xc7   : > { %v420_v7 = vsel %vm413_vm5, %v2496_v20, %v289_v6  ;;  %v682_v57 = vsel %vm413_vm5, %v3273_v21, %v553_v25 }
  0xc8   : > { %389 = vrot.lane.b32.xlu1 %v2782_v0, %s2223_s6  ;;  %302 = vrot.lane.b32.xlu0 %v3271_v30, %s2222_s5  ;;  %v1191_v0 = vrot.slane %v2951_v10, 1 }
  0xca   : > { %v378_v16 = vpop.permute.xlu1 %377  ;;  %v291_v23 = vpop.permute.xlu0 %290 }
  0xcb   : > { %v437_v53 = vsel %vm430_vm6, %v420_v7, %v378_v16  ;;  %v421_v19 = vsel %vm413_vm5, %v3270_v29, %v291_v23 }
  0xcc   : > { %1308 = vrot.lane.b32.xlu1 %v2840_v28, %s2223_s6  ;;  %1222 = vrot.lane.b32.xlu0 %v3272_v51, %s2222_s5  ;;  %v3276_v28 = vrot.slane %v2686_v11, 1 }
  0xcd   : > { %1954 = vmatprep.mubr.msk.f32.mxu0 %vm711_vm7, %v437_v53 }
  0xce   : > { %v641_v39 = vpop.permute.xlu1 %640  ;;  %v555_v5 = vpop.permute.xlu0 %554  ;;  %v1193_v33 = vsel %vm235_vm1, %v1191_v0, %v3276_v28 }
  0xcf   : > { %v698_v35 = vsel %vm430_vm6, %v682_v57, %v641_v39  ;;  %v683_v15 = vsel %vm413_vm5, %v3277_v8, %v555_v5 }
  0xd0   : > { %1310 = vrot.lane.b32.xlu1 %v3274_v34, %s2223_s6  ;;  %391 = vrot.lane.b32.xlu0 %v3275_v44, %s2223_s6  ;;  %v3280_v34 = vld [vmem:[#allocation9_spill] sm:$0xff] }
  0xd1   : > { %1926 = vmatprep.mubr.msk.f32.mxu1 %vm711_vm7, %v698_v35 }
  0xd2   : > { %v643_v38 = vpop.permute.xlu1 %642  ;;  %v380_v42 = vpop.permute.xlu0 %379 }
  0xd3   : > { %v699_v13 = vsel %vm430_vm6, %v683_v15, %v643_v38  ;;  %v438_v40 = vsel %vm430_vm6, %v421_v19, %v380_v42 }
  0xd4   : > { %1224 = vrot.lane.b32.xlu1 %v1193_v33, %s2222_s5  ;;  %304 = vrot.lane.b32.xlu0 %v2802_v4, %s2222_s5 }
  0xd5   : > { %1927 = vmatmul.mubr.msk.f32.gmra.mrb[6].mxu1 %vm711_vm7, %v699_v13  ;;  %1955 = vmatmul.mubr.msk.f32.gmra.mrb[6].mxu0 %vm711_vm7, %v438_v40 }
  0xd6   : > { %v1197_v18 = vpop.permute.xlu1 %1196  ;;  %v557_v60 = vpop.permute.xlu0 %556 }
  0xd7   : > { %v684_v4 = vsel %vm413_vm5, %v2703_v59, %v557_v60 }
  0xd8   : > { %393 = vrot.lane.b32.xlu1 %v2811_v3, %s2223_s6  ;;  %306 = vrot.lane.b32.xlu0 %v2693_v9, %s2222_s5  ;;  %v1332_v9 = vsel %vm413_vm5, %v2395_v31, %v1197_v18 }
  0xda   : > { %v645_v14 = vpop.permute.xlu1 %644  ;;  %v559_v50 = vpop.permute.xlu0 %558 }
  0xdb   : > { %v700_v45 = vsel %vm430_vm6, %v684_v4, %v645_v14 }
  0xdc   : > { %1312 = vrot.lane.b32.xlu1 %v1281_v63, %s2223_s6  ;;  %1226 = vrot.lane.b32.xlu0 %v2712_v58, %s2222_s5  ;;  %v685_v58 = vsel %vm413_vm5, %v3278_v61, %v559_v50  ;;  %s1856_s5 = sshll.u32 %s1647_s4, 7 }
  0xdd   : > { %1929 = vmatprep.mubr.msk.f32.mxu1 %vm711_vm7, %v700_v45  ;;  %v3281_v45 = vld [vmem:[#allocation10_spill] sm:$0xff]  ;;  %s3171_s8 = scalar_lea.hbm %s3235_s3, %s1856_s5 }
  0xde   : > { %v1285_v3 = vpop.permute.xlu1 %1284  ;;  %v1199_v47 = vpop.permute.xlu0 %1198 }
  0xdf   : > { %v1348_v41 = vsel %vm430_vm6, %v1332_v9, %v1285_v3  ;;  %v1333_v2 = vsel %vm413_vm5, %v2398_v32, %v1199_v47 }
  0xe0   : > { %1314 = vrot.lane.b32.xlu1 %v2733_v62, %s2223_s6  ;;  %395 = vrot.lane.b32.xlu0 %v2737_v26, %s2223_s6 }
  0xe1   : > { %1973 = vmatprep.mubr.msk.f32.mxu0 %vm711_vm7, %v1348_v41 }
  0xe2   : > { %v1287_v46 = vpop.permute.xlu1 %1286  ;;  %v647_v31 = vpop.permute.xlu0 %646 }
  0xe3   : > { %v1349_v56 = vsel %vm430_vm6, %v1333_v2, %v1287_v46  ;;  %v701_v52 = vsel %vm430_vm6, %v685_v58, %v647_v31 }
  0xe4   : > { %1930 = vmatmul.mubr.msk.f32.gmra.mrb[8].mxu1 %vm711_vm7, %v701_v52  ;;  %1974 = vmatmul.mubr.msk.f32.vlgmr.msra.gmra.mrb[0].mxu0 %vm711_vm7, %v1349_v56 }
  0xe6   : > { %v1201_v62 = vpop.permute.xlu1 %1200  ;;  %v561_v26 = vpop.permute.xlu0 %560 }
  0xe7   : > { %v686_v12 = vsel %vm413_vm5, %v2760_v49, %v561_v26  ;;  %v1334_v32 = vsel %vm413_vm5, %v2496_v20, %v1201_v62 }
  0xea   : > { %v649_v22 = vpop.permute.xlu1 %648  ;;  %v563_v24 = vpop.permute.xlu0 %562 }
  0xeb   : > { %v702_v36 = vsel %vm430_vm6, %v686_v12, %v649_v22  ;;  %v687_v55 = vsel %vm413_vm5, %v3279_v48, %v563_v24 }
  0xec   : > { %1932 = vmatprep.mubr.msk.f32.mxu1 %vm711_vm7, %v702_v36 }
  0xee   : > { %v1289_v27 = vpop.permute.xlu1 %1288  ;;  %v1203_v43 = vpop.permute.xlu0 %1202 }
  0xef   : > { %v1350_v54 = vsel %vm430_vm6, %v1334_v32, %v1289_v27  ;;  %v1335_v25 = vsel %vm413_vm5, %v3270_v29, %v1203_v43 }
  0xf0   : > { %1976 = vmatprep.mubr.msk.f32.mxu0 %vm711_vm7, %v1350_v54 }
  0xf2   : > { %v1291_v6 = vpop.permute.xlu1 %1290  ;;  %v651_v30 = vpop.permute.xlu0 %650 }
  0xf3   : > { %v1351_v7 = vsel %vm430_vm6, %v1335_v25, %v1291_v6  ;;  %v703_v16 = vsel %vm430_vm6, %v687_v55, %v651_v30 }
  0xf4   : > { %1933 = vmatmul.mubr.msk.f32.gmra.mrb[10].mxu1 %vm711_vm7, %v703_v16  ;;  %1977 = vmatmul.mubr.msk.f32.gmra.mrb[2].mxu0 %vm711_vm7, %v1351_v7 }
  0xf6   : > { %v1205_v20 = vpop.permute.xlu1 %1204  ;;  %v565_v23 = vpop.permute.xlu0 %564 }
  0xf7   : > { %v688_v53 = vsel %vm413_vm5, %v2789_v1, %v565_v23  ;;  %v1336_v29 = vsel %vm413_vm5, %v3273_v21, %v1205_v20 }
  0xfa   : > { %v653_v51 = vpop.permute.xlu1 %652  ;;  %v567_v0 = vpop.permute.xlu0 %566 }
  0xfb   : > { %v704_v57 = vsel %vm430_vm6, %v688_v53, %v653_v51  ;;  %v689_v44 = vsel %vm413_vm5, %v3280_v34, %v567_v0 }
  0xfc   : > { %1935 = vmatprep.mubr.msk.f32.mxu1 %vm711_vm7, %v704_v57 }
  0xfe   : > { %v1293_v39 = vpop.permute.xlu1 %1292  ;;  %v1207_v5 = vpop.permute.xlu0 %1206 }
  0xff   : > { %v1352_v35 = vsel %vm430_vm6, %v1336_v29, %v1293_v39  ;;  %v1337_v28 = vsel %vm413_vm5, %v3277_v8, %v1207_v5 }
 0x100   : > { %1979 = vmatprep.mubr.msk.f32.mxu0 %vm711_vm7, %v1352_v35 }
 0x102   : > { %v1295_v33 = vpop.permute.xlu1 %1294  ;;  %v655_v19 = vpop.permute.xlu0 %654 }
 0x103   : > { %v1353_v15 = vsel %vm430_vm6, %v1337_v28, %v1295_v33  ;;  %v705_v38 = vsel %vm430_vm6, %v689_v44, %v655_v19 }
 0x104   : > { %1936 = vmatmul.mubr.msk.f32.gmra.mrb[12].mxu1 %vm711_vm7, %v705_v38  ;;  %1980 = vmatmul.mubr.msk.f32.gmra.mrb[4].mxu0 %vm711_vm7, %v1353_v15 }
 0x106   : > { %v1209_v42 = vpop.permute.xlu1 %1208  ;;  %v569_v13 = vpop.permute.xlu0 %568 }
 0x107   : > { %v690_v40 = vsel %vm413_vm5, %v2818_v17, %v569_v13  ;;  %v1338_v63 = vsel %vm413_vm5, %v2703_v59, %v1209_v42 }
 0x10a   : > { %v657_v37 = vpop.permute.xlu1 %656  ;;  %v571_v18 = vpop.permute.xlu0 %570 }
 0x10b   : > { %v706_v60 = vsel %vm430_vm6, %v690_v40, %v657_v37  ;;  %v691_v9 = vsel %vm413_vm5, %v3281_v45, %v571_v18 }
 0x10c   : > { %1938 = vmatprep.mubr.msk.f32.mxu1 %vm711_vm7, %v706_v60 }
 0x10e   : > { %v1297_v4 = vpop.permute.xlu1 %1296  ;;  %v1211_v14 = vpop.permute.xlu0 %1210 }
 0x10f   : > { %v1354_v50 = vsel %vm430_vm6, %v1338_v63, %v1297_v4  ;;  %v1339_v3 = vsel %vm413_vm5, %v3278_v61, %v1211_v14 }
 0x110   : > { %1982 = vmatprep.mubr.msk.f32.mxu0 %vm711_vm7, %v1354_v50 }
 0x112   : > { %v1299_v47 = vpop.permute.xlu1 %1298  ;;  %v659_v41 = vpop.permute.xlu0 %658 }
 0x113   : > { %v1355_v58 = vsel %vm430_vm6, %v1339_v3, %v1299_v47  ;;  %v707_v2 = vsel %vm430_vm6, %v691_v9, %v659_v41 }
 0x114   : > { %1939 = vmatmul.mubr.msk.f32.gmra.mrb[14].mxu1 %vm711_vm7, %v707_v2  ;;  %1983 = vmatmul.mubr.msk.f32.gmra.mrb[6].mxu0 %vm711_vm7, %v1355_v58 }
 0x116   : > { %v1213_v46 = vpop.permute.xlu1 %1212  ;;  %v293_v31 = vpop.permute.xlu0 %292 }
 0x117   : > { %v422_v56 = vsel %vm413_vm5, %v3273_v21, %v293_v31  ;;  %v1340_v12 = vsel %vm413_vm5, %v2760_v49, %v1213_v46 }
 0x11a   : > { %v382_v52 = vpop.permute.xlu1 %381  ;;  %v295_v62 = vpop.permute.xlu0 %294 }
 0x11b   : > { %v439_v26 = vsel %vm430_vm6, %v422_v56, %v382_v52  ;;  %v423_v32 = vsel %vm413_vm5, %v3277_v8, %v295_v62 }
 0x11c   : > { %1957 = vmatprep.mubr.msk.f32.mxu1 %vm711_vm7, %v439_v26 }
 0x11e   : > { %v1301_v22 = vpop.permute.xlu1 %1300  ;;  %v1215_v24 = vpop.permute.xlu0 %1214 }
 0x11f   : > { %v1356_v36 = vsel %vm430_vm6, %v1340_v12, %v1301_v22  ;;  %v1341_v21 = vsel %vm413_vm5, %v3279_v48, %v1215_v24 }
 0x120   : > { %1985 = vmatprep.mubr.msk.f32.mxu0 %vm711_vm7, %v1356_v36  ;;  %v3129_v36 = vld [vmem:[%s3234_s2] ss:$0 sm:$0xff] }
 0x122   : > { %v1303_v27 = vpop.permute.xlu1 %1302  ;;  %v384_v43 = vpop.permute.xlu0 %383 }
 0x123   : > { %v1357_v54 = vsel %vm430_vm6, %v1341_v21, %v1303_v27  ;;  %v440_v55 = vsel %vm430_vm6, %v423_v32, %v384_v43 }
 0x124   : > { %1958 = vmatmul.mubr.msk.f32.vlgmr.msra.gmra.mrb[8].mxu1 %vm711_vm7, %v440_v55  ;;  %1986 = vmatmul.mubr.msk.f32.gmra.mrb[8].mxu0 %vm711_vm7, %v1357_v54 }
 0x126   : > { %v1217_v25 = vpop.permute.xlu1 %1216  ;;  %v297_v6 = vpop.permute.xlu0 %296 }
 0x127   : > { %v424_v30 = vsel %vm413_vm5, %v2703_v59, %v297_v6  ;;  %v1342_v20 = vsel %vm413_vm5, %v2789_v1, %v1217_v25 }
 0x12a   : > { %v386_v7 = vpop.permute.xlu1 %385  ;;  %v299_v8 = vpop.permute.xlu0 %298 }
 0x12b   : > { %v441_v16 = vsel %vm430_vm6, %v424_v30, %v386_v7  ;;  %v425_v0 = vsel %vm413_vm5, %v3278_v61, %v299_v8 }
 0x12c   : > { %1960 = vmatprep.mubr.msk.f32.mxu1 %vm711_vm7, %v441_v16 }
 0x12e   : > { %v1305_v23 = vpop.permute.xlu1 %1304  ;;  %v1219_v53 = vpop.permute.xlu0 %1218 }
 0x12f   : > { %v1358_v51 = vsel %vm430_vm6, %v1342_v20, %v1305_v23  ;;  %v1343_v59 = vsel %vm413_vm5, %v3280_v34, %v1219_v53 }
 0x130   : > { %1988 = vmatprep.mubr.msk.f32.mxu0 %vm711_vm7, %v1358_v51 }
 0x132   : > { %v1307_v57 = vpop.permute.xlu1 %1306  ;;  %v388_v29 = vpop.permute.xlu0 %387 }
 0x133   : > { %v1359_v39 = vsel %vm430_vm6, %v1343_v59, %v1307_v57  ;;  %v442_v5 = vsel %vm430_vm6, %v425_v0, %v388_v29 }
 0x134   : > { %1961 = vmatmul.mubr.msk.f32.gmra.mrb[10].mxu1 %vm711_vm7, %v442_v5  ;;  %1989 = vmatmul.mubr.msk.f32.gmra.mrb[10].mxu0 %vm711_vm7, %v1359_v39 }
 0x136   : > { %v1221_v35 = vpop.permute.xlu1 %1220  ;;  %v301_v44 = vpop.permute.xlu0 %300 }
 0x137   : > { %v426_v28 = vsel %vm413_vm5, %v2760_v49, %v301_v44  ;;  %v1344_v15 = vsel %vm413_vm5, %v2818_v17, %v1221_v35 }
 0x13a   : > { %v390_v33 = vpop.permute.xlu1 %389  ;;  %v303_v61 = vpop.permute.xlu0 %302 }
 0x13b   : > { %v443_v19 = vsel %vm430_vm6, %v426_v28, %v390_v33  ;;  %v427_v40 = vsel %vm413_vm5, %v3279_v48, %v303_v61 }
 0x13c   : > { %1963 = vmatprep.mubr.msk.f32.mxu1 %vm711_vm7, %v443_v19 }
 0x13e   : > { %v1309_v38 = vpop.permute.xlu1 %1308  ;;  %v1223_v42 = vpop.permute.xlu0 %1222 }
 0x13f   : > { %v1360_v13 = vsel %vm430_vm6, %v1344_v15, %v1309_v38  ;;  %v1345_v49 = vsel %vm413_vm5, %v3281_v45, %v1223_v42 }
 0x140   : > { %1991 = vmatprep.mubr.msk.f32.mxu0 %vm711_vm7, %v1360_v13 }
 0x142   : > { %v1311_v37 = vpop.permute.xlu1 %1310  ;;  %v392_v18 = vpop.permute.xlu0 %391 }
 0x143   : > { %v1361_v60 = vsel %vm430_vm6, %v1345_v49, %v1311_v37  ;;  %v444_v63 = vsel %vm430_vm6, %v427_v40, %v392_v18 }
 0x144   : > { %1964 = vmatmul.mubr.msk.f32.gmra.mrb[12].mxu1 %vm711_vm7, %v444_v63  ;;  %1992 = vmatmul.mubr.msk.f32.gmra.mrb[12].mxu0 %vm711_vm7, %v1361_v60 }
 0x146   : > { %v1225_v17 = vpop.permute.xlu1 %1224  ;;  %v305_v4 = vpop.permute.xlu0 %304 }
 0x147   : > { %v428_v14 = vsel %vm413_vm5, %v2789_v1, %v305_v4  ;;  %v1346_v45 = vsel %vm413_vm5, %v2951_v10, %v1225_v17 }
 0x14a   : > { %v394_v50 = vpop.permute.xlu1 %393  ;;  %v307_v48 = vpop.permute.xlu0 %306 }
 0x14b   : > { %v445_v9 = vsel %vm430_vm6, %v428_v14, %v394_v50  ;;  %v429_v58 = vsel %vm413_vm5, %v3280_v34, %v307_v48 }
 0x14c   : > { %1966 = vmatprep.mubr.msk.f32.mxu1 %vm711_vm7, %v445_v9 }
 0x14e   : > { %v1313_v3 = vpop.permute.xlu1 %1312  ;;  %v1227_v47 = vpop.permute.xlu0 %1226 }
 0x14f   : > { %v1362_v41 = vsel %vm430_vm6, %v1346_v45, %v1313_v3  ;;  %v1347_v1 = vsel %vm413_vm5, %v2686_v11, %v1227_v47 }
 0x150   : > { %1994 = vmatprep.mubr.msk.f32.mxu0 %vm711_vm7, %v1362_v41 }
 0x152   : > { %v1315_v2 = vpop.permute.xlu1 %1314  ;;  %v396_v46 = vpop.permute.xlu0 %395 }
 0x153   : > { %v1363_v31 = vsel %vm430_vm6, %v1347_v1, %v1315_v2  ;;  %v446_v10 = vsel %vm430_vm6, %v429_v58, %v396_v46 }
 0x154   : > { %1967 = vmatmul.mubr.msk.f32.gmra.mrb[14].mxu1 %vm711_vm7, %v446_v10  ;;  %1995 = vmatmul.mubr.msk.f32.gmra.mrb[14].mxu0 %vm711_vm7, %v1363_v31 }
 0x178   : > { %v1919_v56 = vpop.f32.mrb[0].mxu1 }
 0x179   : > { %v830_v52 = vpop.f32.mrb[1].mxu1 }
 0x188   : > { %v1922_v62 = vpop.f32.mrb[2].mxu1 }
 0x189   : > { %v840_v26 = vpop.f32.mrb[3].mxu1 }
 0x198   : > { %v1925_v34 = vpop.f32.mrb[4].mxu1 }
 0x199   : > { %v850_v12 = vpop.f32.mrb[5].mxu1 }
 0x1a8   : > { %v1928_v22 = vpop.f32.mrb[6].mxu1 }
 0x1a9   : > { %v860_v24 = vpop.f32.mrb[7].mxu1 }
 0x1b7   : > { %v1975_v11 = vpop.f32.mrb[0].mxu0 }
 0x1b8   : > { %v2017_v32 = vadd.f32 %v1975_v11, %v1919_v56  ;;  %v1484_v21 = vpop.f32.mrb[1].mxu0 }
 0x1b9   : > { %v2018_v27 = vadd.f32 %v1484_v21, %v830_v52 }
 0x1ba   : > { %v1587_v43 = vadd.f32 %v2017_v32, %v3129_v36 }
 0x1bb   : > { %v1586_v54 = vadd.f32 %v2018_v27, %v3129_v36 }
 0x1bc   : > { %v1603_v55 = vmax.f32 %v1587_v43, 0.0 }
 0x1bd   : > { %v1602_v25 = vmax.f32 %v1586_v54, 0.0 }
 0x1be   : > { %1619 = vst [vmem:[%s3135_s27 + $0x8] sm:$0xff] %v1603_v55 }
 0x1bf   : > { %1618 = vst [vmem:[%s3135_s27] sm:$0xff] %v1602_v25 }
 0x1c7   : > { %v1978_v6 = vpop.f32.mrb[2].mxu0 }
 0x1c8   : > { %v2019_v30 = vadd.f32 %v1978_v6, %v1922_v62  ;;  %v1494_v7 = vpop.f32.mrb[3].mxu0 }
 0x1c9   : > { %v2020_v8 = vadd.f32 %v1494_v7, %v840_v26 }
 0x1ca   : > { %v1589_v16 = vadd.f32 %v2019_v30, %v3129_v36 }
 0x1cb   : > { %v1588_v20 = vadd.f32 %v2020_v8, %v3129_v36 }
 0x1cc   : > { %v1605_v23 = vmax.f32 %v1589_v16, 0.0 }
 0x1cd   : > { %v1604_v53 = vmax.f32 %v1588_v20, 0.0 }
 0x1ce   : > { %1621 = vst [vmem:[%s3135_s27 + $0x18] sm:$0xff] %v1605_v23 }
 0x1cf   : > { %1620 = vst [vmem:[%s3135_s27 + $0x10] sm:$0xff] %v1604_v53 }
 0x1d7   : > { %v1981_v51 = vpop.f32.mrb[4].mxu0 }
 0x1d8   : > { %v2021_v0 = vadd.f32 %v1981_v51, %v1925_v34  ;;  %v1504_v59 = vpop.f32.mrb[5].mxu0 }
 0x1d9   : > { %v2022_v57 = vadd.f32 %v1504_v59, %v850_v12 }
 0x1da   : > { %v1591_v29 = vadd.f32 %v2021_v0, %v3129_v36 }
 0x1db   : > { %v1590_v39 = vadd.f32 %v2022_v57, %v3129_v36 }
 0x1dc   : > { %v1607_v5 = vmax.f32 %v1591_v29, 0.0 }
 0x1dd   : > { %v1606_v35 = vmax.f32 %v1590_v39, 0.0 }
 0x1de   : > { %1623 = vst [vmem:[%s3135_s27 + $0x28] sm:$0xff] %v1607_v5 }
 0x1df   : > { %1622 = vst [vmem:[%s3135_s27 + $0x20] sm:$0xff] %v1606_v35 }
 0x1e7   : > { %v1984_v44 = vpop.f32.mrb[6].mxu0 }
 0x1e8   : > { %v2023_v28 = vadd.f32 %v1984_v44, %v1928_v22  ;;  %v1514_v33 = vpop.f32.mrb[7].mxu0 }
 0x1e9   : > { %v2024_v61 = vadd.f32 %v1514_v33, %v860_v24 }
 0x1ea   : > { %v1593_v19 = vadd.f32 %v2023_v28, %v3129_v36 }
 0x1eb   : > { %v1592_v15 = vadd.f32 %v2024_v61, %v3129_v36 }
 0x1ec   : > { %v1609_v38 = vmax.f32 %v1593_v19, 0.0 }
 0x1ed   : > { %v1608_v42 = vmax.f32 %v1592_v15, 0.0 }
 0x1ee   : > { %1625 = vst [vmem:[%s3135_s27 + $0x38] sm:$0xff] %v1609_v38 }
 0x1ef   : > { %1624 = vst [vmem:[%s3135_s27 + $0x30] sm:$0xff] %v1608_v42 }
 0x1f7   : > { %v1959_v13 = vpop.f32.mrb[8].mxu1  ;;  %v1987_v40 = vpop.f32.mrb[8].mxu0 }
 0x1f8   : > { %v2025_v49 = vadd.f32 %v1987_v40, %v1959_v13  ;;  %v1066_v37 = vpop.f32.mrb[9].mxu1  ;;  %v1524_v18 = vpop.f32.mrb[9].mxu0 }
 0x1f9   : > { %v2026_v60 = vadd.f32 %v1524_v18, %v1066_v37 }
 0x1fa   : > { %v1595_v63 = vadd.f32 %v2025_v49, %v3129_v36 }
 0x1fb   : > { %v1594_v17 = vadd.f32 %v2026_v60, %v3129_v36 }
 0x1fc   : > { %v1611_v4 = vmax.f32 %v1595_v63, 0.0 }
 0x1fd   : > { %v1610_v14 = vmax.f32 %v1594_v17, 0.0 }
 0x1fe   : > { %1627 = vst [vmem:[%s3135_s27 + $0x48] sm:$0xff] %v1611_v4 }
 0x1ff   : > { %1626 = vst [vmem:[%s3135_s27 + $0x40] sm:$0xff] %v1610_v14 }
 0x207   : > { %v1962_v50 = vpop.f32.mrb[10].mxu1  ;;  %v1990_v48 = vpop.f32.mrb[10].mxu0 }
 0x208   : > { %v2027_v9 = vadd.f32 %v1990_v48, %v1962_v50  ;;  %v1076_v45 = vpop.f32.mrb[11].mxu1  ;;  %v1534_v3 = vpop.f32.mrb[11].mxu0 }
 0x209   : > { %v2028_v47 = vadd.f32 %v1534_v3, %v1076_v45 }
 0x20a   : > { %v1597_v41 = vadd.f32 %v2027_v9, %v3129_v36 }
 0x20b   : > { %v1596_v58 = vadd.f32 %v2028_v47, %v3129_v36 }
 0x20c   : > { %v1613_v1 = vmax.f32 %v1597_v41, 0.0 }
 0x20d   : > { %v1612_v2 = vmax.f32 %v1596_v58, 0.0 }
 0x20e   : > { %1629 = vst [vmem:[%s3135_s27 + $0x58] sm:$0xff] %v1613_v1 }
 0x20f   : > { %1628 = vst [vmem:[%s3135_s27 + $0x50] sm:$0xff] %v1612_v2 }
 0x217   : > { %v1965_v46 = vpop.f32.mrb[12].mxu1  ;;  %v1993_v31 = vpop.f32.mrb[12].mxu0 }
 0x218   : > { %v2029_v10 = vadd.f32 %v1993_v31, %v1965_v46  ;;  %v1086_v56 = vpop.f32.mrb[13].mxu1  ;;  %v1544_v52 = vpop.f32.mrb[13].mxu0 }
 0x219   : > { %v2030_v62 = vadd.f32 %v1544_v52, %v1086_v56 }
 0x21a   : > { %v1599_v26 = vadd.f32 %v2029_v10, %v3129_v36 }
 0x21b   : > { %v1598_v34 = vadd.f32 %v2030_v62, %v3129_v36 }
 0x21c   : > { %v1615_v12 = vmax.f32 %v1599_v26, 0.0 }
 0x21d   : > { %v1614_v22 = vmax.f32 %v1598_v34, 0.0 }
 0x21e   : > { %1631 = vst [vmem:[%s3135_s27 + $0x68] sm:$0xff] %v1615_v12 }
 0x21f   : > { %1630 = vst [vmem:[%s3135_s27 + $0x60] sm:$0xff] %v1614_v22 }
 0x227   : > { %v1968_v24 = vpop.f32.mrb[14].mxu1  ;;  %v1996_v11 = vpop.f32.mrb[14].mxu0 }
 0x228   : > { %v2031_v32 = vadd.f32 %v1996_v11, %v1968_v24  ;;  %v1096_v21 = vpop.f32.mrb[15].mxu1  ;;  %v1554_v27 = vpop.f32.mrb[15].mxu0 }
 0x229   : > { %v2032_v43 = vadd.f32 %v1554_v27, %v1096_v21 }
 0x22a   : > { %v1601_v54 = vadd.f32 %v2031_v32, %v3129_v36 }
 0x22b   : > { %v1600_v55 = vadd.f32 %v2032_v43, %v3129_v36 }
 0x22c   : > { %v1617_v25 = vmax.f32 %v1601_v54, 0.0 }
 0x22d   : > { %v1616_v6 = vmax.f32 %v1600_v55, 0.0 }
 0x22e   : > { %1633 = vst [vmem:[%s3135_s27 + $0x78] sm:$0xff] %v1617_v25 }
 0x22f   : > { %1632 = vst [vmem:[%s3135_s27 + $0x70] sm:$0xff] %v1616_v6 }
 0x230   : > { %2138 = shalt.err (!%p2135_p6)
}
 0x231   : > { %s2139_s11 = scalar_lea.hbm %s3171_s8, 2048  ;;  %s2143_s29 = scalar_lea.hbm %s3235_s3, 8192 }
 0x232   : > { %p2140_p7 = scmp.ne.s32.totalorder %s3171_s8, %s2139_s11  ;;  %p2144_p11 = scmp.lt.u32.totalorder %s3171_s8, %s3235_s3 }
 0x233   : > { %p2145_p12 = scmp.lt.u32.totalorder %s2143_s29, %s2139_s11  ;;  %p2147_p0 = scmp.lt.u32.totalorder %s2139_s11, %s3171_s8 }
 0x234   : > { %p2141_p9 = pnand %p2140_p7, %p2297_p3 }
 0x235   : > { %p2146_p13 = por %p2145_p12, %p2144_p11 }
 0x236   : > { %p2142_p10 = pneg %p2141_p9 }
 0x237   : > { %p2148_p1 = por %p2147_p0, %p2146_p13 }
 0x239   : > { %p2149_p2 = pnand %p2148_p1, %p2142_p10 }
 0x23b   : > { %2152 = shalt.err (!%p2149_p2)
}
 0x23c   : > { %s2225_s15 = smov 128  }
 0x23d   : > { %2050 = dma.vmem_to_hbm [thread:$0]  (%p2297_p3), %s3173_s7, 2048, %s3171_s8, %s3179_s9, %s2225_s15, %s2225_s15, %s2223_s6  }
 0x23e PF: > { %p2056_p4 = scmp.ge.s32.totalorder %s2219_s19, 2  ;;  %s1665_s16 = sand.u32 1, %s2191_s12  }
 0x23f   : > { %s1666_s10 = scalar_lea.sflag [#allocation3], %s1665_s16 }
 0x240   : > { %p2053_p5 = pnand %p2056_p4, %p2306_p8 }
 0x242   : > { %2186 = dma.done.wait (!%p2053_p5), %s1666_s10, 2048  }
 0x243   : > { %2188 = vsyncadd (!%p2053_p5), %s1666_s10, 4294965248  ;;  %s16_s19 = sadd.s32 1, %s2219_s19   ;;  %s3282_s12 = smov %s2195_s13 }
 0x244   : > { %p13_p6 = scmp.ge.s32.totalorder %s16_s19, 6   ;;  %s3283_s13 = smov %s2199_s14 }
 0x245   : > { %s3284_s14 = smov %s2315_s30  ;;  %s3285_s15 = smov %s2211_s17 }
 0x246   : > { %s3286_s16 = smov %s2215_s18  ;;  %s3287_s17 = smov %s3290_s22 }
 0x247   : > { %s3288_s18 = smov %s3294_s23  ;;  %15 = sbr.rel (!%p13_p6) target bundleno = 5 (0x5), region = 72 }
 0x24e   :  { %1671 = vsyncpa [#allocation3], 1 }
 0x24f   :  { %1673 = vsyncpa [#allocation3 + $0x1], 1 }

</bundles_post_ra>
